<compile_context>
chip_gen: v7x
topology: tpu7x:2x2x1
jax: 0.10.0
libtpu: 0.0.40
codegen_flags: <defaults>
</compile_context>

<pallas_src>
import jax
import jax.numpy as jnp
from jax import lax
from jax.experimental import pallas as pl
from jax.experimental.pallas import tpu as pltpu

_BN_EPS = 1e-5


def _fused_mul_conv_bn_kernel(x_ref, s_ref, w_ref, g_ref, b_ref, o_ref):
    # x_ref: [Cin, P]   f32  (resident: constant index_map -> DMA'd once)
    # s_ref: [Cin, 1]   f32  (resident)
    # w_ref: [tm, Cin]  bf16 (streamed per Cout tile, fed to the MXU as-is)
    # g_ref, b_ref: [tm, 1] f32
    # o_ref: [tm, P]    f32
    #
    # Fold the per-channel multiplier into x (f32 math), then MXU in bf16 with
    # f32 accumulation. Recomputed each step (cheap: Cin*P elems) so it stays
    # correct when the "parallel" grid axis is sharded across v7x's two cores.
    xb = (x_ref[...] * s_ref[...]).astype(jnp.bfloat16)                  # [Cin, P]
    y = jnp.dot(w_ref[...], xb, preferred_element_type=jnp.float32)      # [tm, P] f32

    # BatchNorm2d (training mode): per-channel mean / biased variance over P, in f32.
    p = y.shape[1]
    mean = jnp.sum(y, axis=1, keepdims=True) * (1.0 / p)                  # [tm, 1]
    diff = y - mean
    var = jnp.sum(diff * diff, axis=1, keepdims=True) * (1.0 / p)         # [tm, 1]
    inv = lax.rsqrt(var + _BN_EPS)
    o_ref[...] = diff * inv * g_ref[...] + b_ref[...]


def _round_up(x, m):
    return m * pl.cdiv(x, m)


def _default_tile_cout(cout):
    half = cout // 2
    if cout % 2 == 0 and half % 8 == 0:
        return half                     # 2 grid steps (megacore-friendly on v7x)
    return _round_up(cout, 8)           # single padded tile


def make_fused_mul_conv_bn(weight_oc_ic, gamma, beta, *, tile_cout=None):
    """One-time parameter preparation (bf16 cast + Cout padding), returns apply(x, scale).

    weight_oc_ic: [Cout, Cin] (1x1 conv weight squeezed); gamma/beta: [Cout].
    Doing the cast/pad here (instead of per call) removes ~12 MB of per-call HBM
    traffic on the real-size weight.
    """
    Cout, Cin = weight_oc_ic.shape
    if tile_cout is None:
        tile_cout = _default_tile_cout(Cout)
    cout_pad = _round_up(Cout, tile_cout)
    pad = cout_pad - Cout

    w = weight_oc_ic.astype(jnp.bfloat16)          # bf16 stream: halves the big DMA
    g = gamma.astype(jnp.float32)
    b = beta.astype(jnp.float32)
    if pad:
        w = jnp.pad(w, ((0, pad), (0, 0)))
        g = jnp.pad(g, (0, pad))
        b = jnp.pad(b, (0, pad))
    w = jax.block_until_ready(w)                   # materialize prepared params once
    g = jax.block_until_ready(g.reshape(cout_pad, 1))
    b = jax.block_until_ready(b.reshape(cout_pad, 1))

    def apply(x_nchw, scale_nc11):
        """x_nchw: [1, Cin, H, W]; scale_nc11: [1, Cin, 1, 1] -> [1, Cout, H, W]."""
        N, cin, H, W = x_nchw.shape
        if N != 1:
            # TODO(synk): N > 1 needs per-batch handling of the scale fold plus an
            # NCHW->[Cin, N*H*W] transpose; the module spec only uses N == 1.
            raise NotImplementedError("fused_mul_conv_bn currently supports N == 1 only")
        assert cin == Cin
        P = H * W

        # N == 1: NCHW is already a contiguous [Cin, H*W] slab -> no transposes.
        x_cp = x_nchw.reshape(Cin, P).astype(jnp.float32)
        s_col = scale_nc11.reshape(Cin, 1).astype(jnp.float32)

        out_cp = pl.pallas_call(
            _fused_mul_conv_bn_kernel,
            out_shape=jax.ShapeDtypeStruct((cout_pad, P), jnp.float32),
            grid_spec=pltpu.PrefetchScalarGridSpec(
                num_scalar_prefetch=0,
                grid=(cout_pad // tile_cout,),
                in_specs=[
                    pl.BlockSpec((Cin, P), lambda j: (0, 0)),            # x: resident
                    pl.BlockSpec((Cin, 1), lambda j: (0, 0)),            # scale: resident
                    pl.BlockSpec((tile_cout, Cin), lambda j: (j, 0)),    # weight: streamed
                    pl.BlockSpec((tile_cout, 1), lambda j: (j, 0)),      # gamma
                    pl.BlockSpec((tile_cout, 1), lambda j: (j, 0)),      # beta
                ],
                out_specs=pl.BlockSpec((tile_cout, P), lambda j: (j, 0)),
            ),
            compiler_params=pltpu.CompilerParams(
                dimension_semantics=("parallel",),   # Cout tiles independent (megacore)
                vmem_limit_bytes=32 << 20,           # ~12 MiB working set at full size
            ),
        )(x_cp, s_col, w, g, b)

        if pad:
            out_cp = out_cp[:Cout]
        return out_cp.reshape(1, Cout, H, W)

    return apply


# TODO(synk): BatchNorm2d running_mean / running_var updates (stateful side effect of
# the PyTorch module in training mode) are not computed/returned; only the forward
# activation is produced.


def _reference_f32(x_nchw, scale_nc11, weight_oc_ic, gamma, beta):
    xm = x_nchw * scale_nc11
    y = jnp.einsum("nchw,oc->nohw", xm, weight_oc_ic,
                   precision=lax.Precision.HIGHEST)
    mean = jnp.mean(y, axis=(0, 2, 3), keepdims=True)
    var = jnp.mean((y - mean) ** 2, axis=(0, 2, 3), keepdims=True)
    return (y - mean) / jnp.sqrt(var + _BN_EPS) * gamma.reshape(1, -1, 1, 1) \
        + beta.reshape(1, -1, 1, 1)


def _reference_bf16_matched(x_nchw, scale_nc11, weight_oc_ic, gamma, beta):
    # Mirrors the kernel's bf16 rounding of the MXU inputs (f32 accumulation / BN).
    _, Cin, H, W = x_nchw.shape
    P = H * W
    xs = (x_nchw.reshape(Cin, P).astype(jnp.float32)
          * scale_nc11.reshape(Cin, 1).astype(jnp.float32))
    xs_b = xs.astype(jnp.bfloat16).astype(jnp.float32)
    w_b = weight_oc_ic.astype(jnp.bfloat16).astype(jnp.float32)
    y = jnp.dot(w_b, xs_b, precision=lax.Precision.HIGHEST)              # [Cout, P]
    mean = jnp.mean(y, axis=1, keepdims=True)
    var = jnp.mean((y - mean) ** 2, axis=1, keepdims=True)
    out = (y - mean) / jnp.sqrt(var + _BN_EPS) * gamma.reshape(-1, 1) \
        + beta.reshape(-1, 1)
    return out.reshape(1, -1, H, W)


def _run_case(key, Cin, Cout, H, W, tile_cout=None):
    k1, k2, k3, k4, k5 = jax.random.split(key, 5)
    x = jax.random.normal(k1, (1, Cin, H, W), dtype=jnp.float32)
    s = jax.random.normal(k2, (1, Cin, 1, 1), dtype=jnp.float32)
    conv_w = jax.random.normal(k3, (Cout, Cin), dtype=jnp.float32) * 0.02
    gamma = 1.0 + 0.1 * jax.random.normal(k4, (Cout,), dtype=jnp.float32)
    beta = 0.1 * jax.random.normal(k5, (Cout,), dtype=jnp.float32)

    apply = make_fused_mul_conv_bn(conv_w, gamma, beta, tile_cout=tile_cout)
    out = jax.block_until_ready(apply(x, s))
    assert out.shape == (1, Cout, H, W)

    # Tight check against a reference with the same bf16 rounding of the MXU inputs
    # (validates the kernel math: fold, matmul, training-mode BN).
    ref_matched = _reference_bf16_matched(x, s, conv_w, gamma, beta)
    assert jnp.allclose(out, ref_matched, atol=1e-3, rtol=1e-3)

    # Looser check against the pure-f32 module semantics; tolerance reflects the
    # ~2^-8 relative error from streaming weight / scaled activations in bf16.
    ref_f32 = _reference_f32(x, s, conv_w, gamma, beta)
    assert jnp.allclose(out, ref_f32, atol=3e-2, rtol=3e-2)


if __name__ == "__main__":
    # Small shapes consistent with the module (original: N=1, Cin=3456, Cout=576, 7x7).
    key = jax.random.PRNGKey(0)
    ka, kb = jax.random.split(key)

    # Cout=288 -> default tile 144, 2 exact grid steps (no padding), megacore-friendly.
    _run_case(ka, Cin=384, Cout=288, H=7, W=7)

    # Cout=200 exercises the pad-to-tile path (200 -> 208, single padded tile).
    _run_case(kb, Cin=256, Cout=200, H=7, W=7)

    print("KERNEL_OK")
</pallas_src>

<mosaic_0001>
module attributes {stable_mosaic.version = 11 : i64} {
  func.func @_fused_mul_conv_bn_kernel(%arg0: i32, %arg1: memref<384x49xf32, #tpu.memory_space<vmem>>, %arg2: memref<384x1xf32, #tpu.memory_space<vmem>>, %arg3: memref<144x384xbf16, #tpu.memory_space<vmem>>, %arg4: memref<144x1xf32, #tpu.memory_space<vmem>>, %arg5: memref<144x1xf32, #tpu.memory_space<vmem>>, %arg6: memref<144x49xf32, #tpu.memory_space<vmem>>) attributes {dimension_semantics = [#tpu.dimension_semantics<parallel>], iteration_bounds = array<i64: 2>, scalar_prefetch = 0 : i64, scratch_operands = 0 : i64, tpu.core_type = #tpu.core_type<tc>, window_params = [{pipeline_mode = #tpu.pipeline_mode<synchronous>, transform_indices = @transform_0, window_bounds = array<i64: 384, 49>}, {pipeline_mode = #tpu.pipeline_mode<synchronous>, transform_indices = @transform_1, window_bounds = array<i64: 384, 1>}, {transform_indices = @transform_2, window_bounds = array<i64: 144, 384>}, {transform_indices = @transform_3, window_bounds = array<i64: 144, 1>}, {transform_indices = @transform_4, window_bounds = array<i64: 144, 1>}, {transform_indices = @transform_5, window_bounds = array<i64: 144, 49>}]} {
    %c0 = arith.constant 0 : index
    %c0_0 = arith.constant 0 : index
    %0 = vector.load %arg1[%c0, %c0_0] : memref<384x49xf32, #tpu.memory_space<vmem>>, vector<384x49xf32>
    %c0_1 = arith.constant 0 : index
    %c0_2 = arith.constant 0 : index
    %1 = vector.load %arg2[%c0_1, %c0_2] : memref<384x1xf32, #tpu.memory_space<vmem>>, vector<384x1xf32>
    %2 = vector.broadcast %1 : vector<384x1xf32> to vector<384x49xf32>
    %3 = arith.mulf %0, %2 : vector<384x49xf32>
    %4 = arith.truncf %3 : vector<384x49xf32> to vector<384x49xbf16>
    %c0_3 = arith.constant 0 : index
    %c0_4 = arith.constant 0 : index
    %5 = vector.load %arg3[%c0_3, %c0_4] : memref<144x384xbf16, #tpu.memory_space<vmem>>, vector<144x384xbf16>
    %cst = arith.constant dense<0.000000e+00> : vector<144x49xf32>
    %6 = tpu.matmul %5, %4, %cst {dimension_numbers = #tpu.dot_dimension_numbers<[1], [0], [0], [1], [0, 0, 1, 1], [], []>} : vector<144x384xbf16>, vector<384x49xbf16>, vector<144x49xf32> -> vector<144x49xf32>
    %cst_5 = arith.constant dense<0.000000e+00> : vector<144xf32>
    %7 = vector.multi_reduction <add>, %6, %cst_5 [1] : vector<144x49xf32> to vector<144xf32>
    %8 = vector.shape_cast %7 : vector<144xf32> to vector<144x1xf32>
    %cst_6 = arith.constant 0.0204081628 : f32
    %9 = vector.broadcast %cst_6 : f32 to vector<144x1xf32>
    %10 = arith.mulf %8, %9 : vector<144x1xf32>
    %11 = vector.broadcast %10 : vector<144x1xf32> to vector<144x49xf32>
    %12 = arith.subf %6, %11 : vector<144x49xf32>
    %13 = arith.mulf %12, %12 : vector<144x49xf32>
    %cst_7 = arith.constant dense<0.000000e+00> : vector<144xf32>
    %14 = vector.multi_reduction <add>, %13, %cst_7 [1] : vector<144x49xf32> to vector<144xf32>
    %15 = vector.shape_cast %14 : vector<144xf32> to vector<144x1xf32>
    %cst_8 = arith.constant 0.0204081628 : f32
    %16 = vector.broadcast %cst_8 : f32 to vector<144x1xf32>
    %17 = arith.mulf %15, %16 : vector<144x1xf32>
    %cst_9 = arith.constant 9.99999974E-6 : f32
    %18 = vector.broadcast %cst_9 : f32 to vector<144x1xf32>
    %19 = arith.addf %17, %18 : vector<144x1xf32>
    %20 = math.rsqrt %19 : vector<144x1xf32>
    %21 = vector.broadcast %20 : vector<144x1xf32> to vector<144x49xf32>
    %22 = arith.mulf %12, %21 : vector<144x49xf32>
    %c0_10 = arith.constant 0 : index
    %c0_11 = arith.constant 0 : index
    %23 = vector.load %arg4[%c0_10, %c0_11] : memref<144x1xf32, #tpu.memory_space<vmem>>, vector<144x1xf32>
    %24 = vector.broadcast %23 : vector<144x1xf32> to vector<144x49xf32>
    %25 = arith.mulf %22, %24 : vector<144x49xf32>
    %c0_12 = arith.constant 0 : index
    %c0_13 = arith.constant 0 : index
    %26 = vector.load %arg5[%c0_12, %c0_13] : memref<144x1xf32, #tpu.memory_space<vmem>>, vector<144x1xf32>
    %27 = vector.broadcast %26 : vector<144x1xf32> to vector<144x49xf32>
    %28 = arith.addf %25, %27 : vector<144x49xf32>
    %c0_14 = arith.constant 0 : index
    %c0_15 = arith.constant 0 : index
    %29 = vector.load %arg6[%c0_14, %c0_15] : memref<144x49xf32, #tpu.memory_space<vmem>>, vector<144x49xf32>
    tpu.vector_store %arg6[%c0_14, %c0_15], %28 {strides = array<i32>} : memref<144x49xf32, #tpu.memory_space<vmem>>, vector<144x49xf32>,
    return
  }
  func.func @transform_0(%arg0: i32) -> (i32, i32) {
    %c0_i32 = arith.constant 0 : i32
    %c0_i32_0 = arith.constant 0 : i32
    %c0_i32_1 = arith.constant 0 : i32
    return %c0_i32, %c0_i32_0 : i32, i32
  }
  func.func @transform_1(%arg0: i32) -> (i32, i32) {
    %c0_i32 = arith.constant 0 : i32
    %c0_i32_0 = arith.constant 0 : i32
    %c0_i32_1 = arith.constant 0 : i32
    return %c0_i32, %c0_i32_0 : i32, i32
  }
  func.func @transform_2(%arg0: i32) -> (i32, i32) {
    %c0_i32 = arith.constant 0 : i32
    %c0_i32_0 = arith.constant 0 : i32
    return %arg0, %c0_i32 : i32, i32
  }
  func.func @transform_3(%arg0: i32) -> (i32, i32) {
    %c0_i32 = arith.constant 0 : i32
    %c0_i32_0 = arith.constant 0 : i32
    return %arg0, %c0_i32 : i32, i32
  }
  func.func @transform_4(%arg0: i32) -> (i32, i32) {
    %c0_i32 = arith.constant 0 : i32
    %c0_i32_0 = arith.constant 0 : i32
    return %arg0, %c0_i32 : i32, i32
  }
  func.func @transform_5(%arg0: i32) -> (i32, i32) {
    %c0_i32 = arith.constant 0 : i32
    %c0_i32_0 = arith.constant 0 : i32
    return %arg0, %c0_i32 : i32, i32
  }
}

</mosaic_0001>

<bundles_post_ra>
// kernel: tpu_custom_call.1
= control target key start
LH: loop header
LB: loop body
LE: loop exit
PB: predicated region body
PF: predicated region fallthrough
CT: control target
= control target key end

     0   :  { %s1963_s18 = smov 0   ;;  %s2716_s0 = inlined_call_operand.vmem [shape: f32[384,49], index: 0, kind: input, shape index: {}]   ;;  %s2717_s1 = inlined_call_operand.vmem [shape: f32[384,1], index: 1, kind: input, shape index: {}]   ;;  %s2718_s2 = inlined_call_operand.vmem [shape: bf16[288,384], index: 2, kind: input, shape index: {}]   ;;  %s2719_s3 = inlined_call_operand.vmem [shape: f32[288,1], index: 3, kind: input, shape index: {}]   ;;  %s2720_s4 = inlined_call_operand.vmem [shape: f32[288,1], index: 4, kind: input, shape index: {}]   ;;  %s2721_s5 = inlined_call_operand.vmem [shape: f32[288,49], index: 5, kind: output, shape index: {}]  }
   0x1 LB: > { %s1659_s19 = sadd.s32 4294967295, %s1928_s18   ;;  %p1663_p0 = scmp.ge.s32.totalorder %s1928_s18, 1  ;;  %s1928_s18 = sphi %s1963_s18, %s15_s18  }
   0x2   : > { %p211_p1 = scmp.lt.s32.totalorder %s1928_s18, 3 }
   0x4   : > { %p212_p2 = pnand %p1663_p0, %p211_p1 }
   0x6   : > { %215 = sbr.rel (%p212_p2) target bundleno = 836 (0x344), region = 40 }
   0xd   : > { %v340_v0 = vld [vmem:[%s2717_s1 + $0x80] sm:$0xff]  ;;  %v1930_v2 = vmov 0   ;;  %v341_v3 = vld [vmem:[%s2717_s1 + $0x88] sm:$0xff]  ;;  %v342_v5 = vld [vmem:[%s2717_s1 + $0x90] sm:$0xff]  ;;  %s250_s15 = smul.u32 18, %s1659_s19  ;;  %v1931_v11 = vmov 0.0  }
   0xe   : > { %v324_v1 = vld [vmem:[%s2717_s1] sm:$0xff]  ;;  %1849 = vset.pattern.permute.xlu1 %v1930_v2  ;;  %1848 = vset.pattern.permute.xlu0 %v1930_v2  ;;  %v325_v4 = vld [vmem:[%s2717_s1 + $0x8] sm:$0xff]  ;;  %v343_v6 = vld [vmem:[%s2717_s1 + $0x98] sm:$0xff]  ;;  %vm1932_vm0 = vmmov 0   ;;  %vm1074_vm1 = vcmask 400384  }
   0xf   : > { %454 = vperm.xlu0 %1848, %v340_v0   ;;  %374 = vperm.xlu1 %1849, %v324_v1   ;;  %v356_v7 = vld [vmem:[%s2717_s1 + $0x100] sm:$0xff]  ;;  %v357_v8 = vld [vmem:[%s2717_s1 + $0x108] sm:$0xff]  ;;  %v326_v9 = vld [vmem:[%s2717_s1 + $0x10] sm:$0xff]  ;;  %p251_p3 = scmp.lt.s32.totalorder %s250_s15, 35 }
  0x10   : > { %v327_v10 = vld [vmem:[%s2717_s1 + $0x18] sm:$0xff]  ;;  %1784 = vmatprep.subr.bf16.mxu1 %v1931_v11  ;;  %v344_v12 = vld [vmem:[%s2717_s1 + $0xa0] sm:$0xff]  ;;  %v345_v13 = vld [vmem:[%s2717_s1 + $0xa8] sm:$0xff]  ;;  %1800 = vmatprep.mubr.msk.bf16.mxu1 %vm1932_vm0, %v1931_v11 }
  0x11   : > { %v358_v14 = vld [vmem:[%s2717_s1 + $0x110] sm:$0xff]  ;;  %v359_v15 = vld [vmem:[%s2717_s1 + $0x118] sm:$0xff]  ;;  %s2733_s15 = smov (!%p251_p3, %s250_s15), 35  ;;  %v328_v16 = vld [vmem:[%s2717_s1 + $0x20] sm:$0xff] }
  0x12   : > { %s1836_s25 = smul.u32 12, %s2733_s15  ;;  %v329_v17 = vld [vmem:[%s2717_s1 + $0x28] sm:$0xff]  ;;  %v346_v18 = vld [vmem:[%s2717_s1 + $0xb0] sm:$0xff]  ;;  %v347_v19 = vld [vmem:[%s2717_s1 + $0xb8] sm:$0xff]  ;;  %s2119_s26 = sshll.u32 %s2733_s15, 3 }
  0x13   : > { %459 = vperm.xlu0 %1848, %v341_v3   ;;  %379 = vperm.xlu1 %1849, %v325_v4   ;;  %v360_v20 = vld [vmem:[%s2717_s1 + $0x120] sm:$0xff]  ;;  %v361_v21 = vld [vmem:[%s2717_s1 + $0x128] sm:$0xff]  ;;  %v330_v22 = vld [vmem:[%s2717_s1 + $0x30] sm:$0xff]  ;;  %s2131_s9 = scalar_lea.vmem %s2719_s3, %s2119_s26  ;;  %s2156_s11 = scalar_lea.vmem %s2720_s4, %s2119_s26 }
  0x14   : > { %s2026_s7 = scalar_lea.vmem %s2718_s2, %s1836_s25  ;;  %v331_v23 = vld [vmem:[%s2717_s1 + $0x38] sm:$0xff]  ;;  %v348_v24 = vld [vmem:[%s2717_s1 + $0xc0] sm:$0xff]  ;;  %v349_v25 = vld [vmem:[%s2717_s1 + $0xc8] sm:$0xff]  ;;  %s2626_s27 = scalar_lea.vmem %s2721_s5, %s2119_s26 }
  0x15   : > { %v362_v26 = vld [vmem:[%s2717_s1 + $0x130] sm:$0xff]  ;;  %v363_v27 = vld [vmem:[%s2717_s1 + $0x138] sm:$0xff]  ;;  %v332_v28 = vld [vmem:[%s2717_s1 + $0x40] sm:$0xff] }
  0x16   : > { %v333_v29 = vld [vmem:[%s2717_s1 + $0x48] sm:$0xff]  ;;  %v350_v30 = vld [vmem:[%s2717_s1 + $0xd0] sm:$0xff]  ;;  %v351_v31 = vld [vmem:[%s2717_s1 + $0xd8] sm:$0xff] }
  0x17   : > { %464 = vperm.xlu0 %1848, %v342_v5   ;;  %469 = vperm.xlu1 %1849, %v343_v6   ;;  %v364_v32 = vld [vmem:[%s2717_s1 + $0x140] sm:$0xff]  ;;  %v365_v33 = vld [vmem:[%s2717_s1 + $0x148] sm:$0xff]  ;;  %v334_v34 = vld [vmem:[%s2717_s1 + $0x50] sm:$0xff] }
  0x18   : > { %v335_v35 = vld [vmem:[%s2717_s1 + $0x58] sm:$0xff]  ;;  %v352_v36 = vld [vmem:[%s2717_s1 + $0xe0] sm:$0xff]  ;;  %v353_v37 = vld [vmem:[%s2717_s1 + $0xe8] sm:$0xff] }
  0x19   : > { %v366_v38 = vld [vmem:[%s2717_s1 + $0x150] sm:$0xff]  ;;  %v367_v39 = vld [vmem:[%s2717_s1 + $0x158] sm:$0xff]  ;;  %v336_v40 = vld [vmem:[%s2717_s1 + $0x60] sm:$0xff] }
  0x1a   : > { %v337_v41 = vld [vmem:[%s2717_s1 + $0x68] sm:$0xff]  ;;  %v354_v42 = vld [vmem:[%s2717_s1 + $0xf0] sm:$0xff]  ;;  %v355_v43 = vld [vmem:[%s2717_s1 + $0xf8] sm:$0xff] }
  0x1b   : > { %534 = vperm.xlu0 %1848, %v356_v7   ;;  %539 = vperm.xlu1 %1849, %v357_v8   ;;  %v368_v44 = vld [vmem:[%s2717_s1 + $0x160] sm:$0xff]  ;;  %v369_v45 = vld [vmem:[%s2717_s1 + $0x168] sm:$0xff]  ;;  %v338_v46 = vld [vmem:[%s2717_s1 + $0x70] sm:$0xff] }
  0x1c   : > { %v339_v47 = vld [vmem:[%s2717_s1 + $0x78] sm:$0xff]  ;;  %v370_v48 = vld [vmem:[%s2717_s1 + $0x170] sm:$0xff]  ;;  %v1310_v50 = vld [vmem:[%s2131_s9 + $0x8] sm:$0xff] }
  0x1d   : > { %v371_v49 = vld [vmem:[%s2717_s1 + $0x178] sm:$0xff]  ;;  %v1309_v51 = vld [vmem:[%s2131_s9] sm:$0xff]  ;;  %v1311_v54 = vld [vmem:[%s2131_s9 + $0x10] sm:$0xff] }
  0x1e   : > { %v1852_v52 = vld [vmem:[%s2026_s7 + $0x4] ss:$12 sps:$4 sm:$0xff]   ;;  %v1312_v56 = vld [vmem:[%s2131_s9 + $0x18] sm:$0xff]  ;;  %v1314_v58 = vld [vmem:[%s2131_s9 + $0x28] sm:$0xff] }
  0x1f   : > { %384 = vperm.xlu0 %1848, %v326_v9   ;;  %389 = vperm.xlu1 %1849, %v327_v10   ;;  %v1313_v53 = vld [vmem:[%s2131_s9 + $0x20] sm:$0xff]  ;;  %v1315_v55 = vld [vmem:[%s2131_s9 + $0x30] sm:$0xff]  ;;  %v1316_v60 = vld [vmem:[%s2131_s9 + $0x38] sm:$0xff] }
  0x20   : > { %896 = vmatprep.mubr.bf16.mxu0 %v1852_v52  ;;  %v1317_v57 = vld [vmem:[%s2131_s9 + $0x40] sm:$0xff]  ;;  %v1319_v59 = vld [vmem:[%s2131_s9 + $0x50] sm:$0xff]  ;;  %v1318_v62 = vld [vmem:[%s2131_s9 + $0x48] sm:$0xff] }
  0x21   : > { %v1321_v61 = vld [vmem:[%s2131_s9 + $0x60] sm:$0xff]  ;;  %v1323_v63 = vld [vmem:[%s2131_s9 + $0x70] sm:$0xff]  ;;  %v1320_v0 = vld [vmem:[%s2131_s9 + $0x58] sm:$0xff] }
  0x22   : > { %v1325_v1 = vld [vmem:[%s2131_s9 + $0x80] sm:$0xff]  ;;  %v1322_v2 = vld [vmem:[%s2131_s9 + $0x68] sm:$0xff]  ;;  %v1324_v4 = vld [vmem:[%s2131_s9 + $0x78] sm:$0xff] }
  0x23   : > { %474 = vperm.xlu0 %1848, %v344_v12   ;;  %479 = vperm.xlu1 %1849, %v345_v13   ;;  %v1435_v3 = vld [vmem:[%s2156_s11] sm:$0xff]  ;;  %v293_v9 = vld [vmem:[%s2716_s0 + $0x88] sm:$0xff]  ;;  %v1437_v12 = vld [vmem:[%s2156_s11 + $0x10] sm:$0xff] }
  0x24   : > { %v292_v7 = vld [vmem:[%s2716_s0 + $0x80] sm:$0xff]  ;;  %v277_v10 = vld [vmem:[%s2716_s0 + $0x8] sm:$0xff]  ;;  %v1442_v52 = vld [vmem:[%s2156_s11 + $0x38] sm:$0xff] }
  0x25   : > { %v276_v8 = vld [vmem:[%s2716_s0] sm:$0xff]  ;;  %v1326_v13 = vld [vmem:[%s2131_s9 + $0x88] sm:$0xff] }
  0x27   : > { %544 = vperm.xlu0 %1848, %v358_v14   ;;  %549 = vperm.xlu1 %1849, %v359_v15  }
  0x2b   : > { %394 = vperm.xlu0 %1848, %v328_v16   ;;  %399 = vperm.xlu1 %1849, %v329_v17  }
  0x2f   : > { %484 = vperm.xlu0 %1848, %v346_v18   ;;  %489 = vperm.xlu1 %1849, %v347_v19  }
  0x33   : > { %554 = vperm.xlu0 %1848, %v360_v20   ;;  %559 = vperm.xlu1 %1849, %v361_v21   ;;  %v294_v20 = vld [vmem:[%s2716_s0 + $0x90] sm:$0xff]  ;;  %v295_v21 = vld [vmem:[%s2716_s0 + $0x98] sm:$0xff] }
  0x37   : > { %404 = vperm.xlu0 %1848, %v330_v22   ;;  %409 = vperm.xlu1 %1849, %v331_v23   ;;  %v1439_v22 = vld [vmem:[%s2156_s11 + $0x20] sm:$0xff] }
  0x3b   : > { %494 = vperm.xlu0 %1848, %v348_v24   ;;  %499 = vperm.xlu1 %1849, %v349_v25   ;;  %v1436_v24 = vld [vmem:[%s2156_s11 + $0x8] sm:$0xff] }
  0x3f   : > { %564 = vperm.xlu0 %1848, %v362_v26   ;;  %569 = vperm.xlu1 %1849, %v363_v27  }
  0x43   : > { %414 = vperm.xlu0 %1848, %v332_v28   ;;  %419 = vperm.xlu1 %1849, %v333_v29  }
  0x47   : > { %504 = vperm.xlu0 %1848, %v350_v30   ;;  %509 = vperm.xlu1 %1849, %v351_v31   ;;  %v308_v30 = vld [vmem:[%s2716_s0 + $0x100] sm:$0xff]  ;;  %v309_v31 = vld [vmem:[%s2716_s0 + $0x108] sm:$0xff] }
  0x4b   : > { %574 = vperm.xlu0 %1848, %v364_v32   ;;  %579 = vperm.xlu1 %1849, %v365_v33   ;;  %v1441_v32 = vld [vmem:[%s2156_s11 + $0x30] sm:$0xff] }
  0x4f   : > { %424 = vperm.xlu0 %1848, %v334_v34   ;;  %429 = vperm.xlu1 %1849, %v335_v35   ;;  %v1438_v34 = vld [vmem:[%s2156_s11 + $0x18] sm:$0xff] }
  0x53   : > { %514 = vperm.xlu0 %1848, %v352_v36   ;;  %519 = vperm.xlu1 %1849, %v353_v37  }
  0x57   : > { %584 = vperm.xlu0 %1848, %v366_v38   ;;  %589 = vperm.xlu1 %1849, %v367_v39   ;;  %v278_v39 = vld [vmem:[%s2716_s0 + $0x10] sm:$0xff] }
  0x5b   : > { %434 = vperm.xlu0 %1848, %v336_v40   ;;  %439 = vperm.xlu1 %1849, %v337_v41   ;;  %v279_v40 = vld [vmem:[%s2716_s0 + $0x18] sm:$0xff]  ;;  %v1443_v41 = vld [vmem:[%s2156_s11 + $0x40] sm:$0xff] }
  0x5f   : > { %524 = vperm.xlu0 %1848, %v354_v42   ;;  %529 = vperm.xlu1 %1849, %v355_v43   ;;  %v1440_v43 = vld [vmem:[%s2156_s11 + $0x28] sm:$0xff] }
  0x63   : > { %594 = vperm.xlu0 %1848, %v368_v44   ;;  %599 = vperm.xlu1 %1849, %v369_v45  }
  0x67   : > { %444 = vperm.xlu0 %1848, %v338_v46   ;;  %449 = vperm.xlu1 %1849, %v339_v47  }
  0x6b   : > { %604 = vperm.xlu0 %1848, %v370_v48   ;;  %609 = vperm.xlu1 %1849, %v371_v49   ;;  %v296_v48 = vld [vmem:[%s2716_s0 + $0xa0] sm:$0xff]  ;;  %v297_v49 = vld [vmem:[%s2716_s0 + $0xa8] sm:$0xff] }
  0x6f   : > { %1334 = vperm.xlu0 %1848, %v1310_v50   ;;  %1329 = vperm.xlu1 %1849, %v1309_v51   ;;  %v1445_v50 = vld [vmem:[%s2156_s11 + $0x50] sm:$0xff] }
  0x73   : > { %1349 = vperm.xlu0 %1848, %v1313_v53   ;;  %1339 = vperm.xlu1 %1849, %v1311_v54  }
  0x77   : > { %1359 = vperm.xlu0 %1848, %v1315_v55   ;;  %1344 = vperm.xlu1 %1849, %v1312_v56  }
  0x7b   : > { %1369 = vperm.xlu0 %1848, %v1317_v57   ;;  %1354 = vperm.xlu1 %1849, %v1314_v58   ;;  %v310_v57 = vld [vmem:[%s2716_s0 + $0x110] sm:$0xff]  ;;  %v311_v58 = vld [vmem:[%s2716_s0 + $0x118] sm:$0xff] }
  0x7f   : > { %1379 = vperm.xlu0 %1848, %v1319_v59   ;;  %1364 = vperm.xlu1 %1849, %v1316_v60   ;;  %v1447_v59 = vld [vmem:[%s2156_s11 + $0x60] sm:$0xff] }
  0x83   : > { %1389 = vperm.xlu0 %1848, %v1321_v61   ;;  %1374 = vperm.xlu1 %1849, %v1318_v62   ;;  %v1444_v61 = vld [vmem:[%s2156_s11 + $0x48] sm:$0xff] }
  0x87   : > { %1399 = vperm.xlu0 %1848, %v1323_v63   ;;  %1384 = vperm.xlu1 %1849, %v1320_v0  }
  0x8b   : > { %1409 = vperm.xlu0 %1848, %v1325_v1   ;;  %1394 = vperm.xlu1 %1849, %v1322_v2   ;;  %v280_v2 = vld [vmem:[%s2716_s0 + $0x20] sm:$0xff] }
  0x8e   : > { %v455_v5 = vpop.permute.xlu0 %454  ;;  %v375_v6 = vpop.permute.xlu1 %374 }
  0x8f   : > { %1455 = vperm.xlu0 %1848, %v1435_v3   ;;  %1404 = vperm.xlu1 %1849, %v1324_v4   ;;  %v628_v14 = vmul.f32 %v455_v5, %v292_v7  ;;  %v612_v17 = vmul.f32 %v375_v6, %v276_v8  ;;  %v281_v3 = vld [vmem:[%s2716_s0 + $0x28] sm:$0xff]  ;;  %v1446_v5 = vld [vmem:[%s2156_s11 + $0x58] sm:$0xff] }
  0x92   : > { %v460_v15 = vpop.permute.xlu0 %459  ;;  %v380_v16 = vpop.permute.xlu1 %379 }
  0x93   : > { %v629_v18 = vmul.f32 %v460_v15, %v293_v9  ;;  %v613_v19 = vmul.f32 %v380_v16, %v277_v10  ;;  %1465 = vperm.xlu0 %1848, %v1437_v12   ;;  %1414 = vperm.xlu1 %1849, %v1326_v13   ;;  %v298_v10 = vld [vmem:[%s2716_s0 + $0xb0] sm:$0xff]  ;;  %v299_v12 = vld [vmem:[%s2716_s0 + $0xb8] sm:$0xff] }
  0x95   : > { %v668_v23 = vpack.c.bf16 %v629_v18, %v628_v14  ;;  %v660_v25 = vpack.c.bf16 %v613_v19, %v612_v17  ;;  %v1448_v14 = vld [vmem:[%s2156_s11 + $0x68] sm:$0xff]  ;;  %v312_v19 = vld [vmem:[%s2716_s0 + $0x120] sm:$0xff] }
  0x96   : > { %v465_v26 = vpop.permute.xlu0 %464  ;;  %v470_v27 = vpop.permute.xlu1 %469 }
  0x97   : > { %v630_v28 = vmul.f32 %v465_v26, %v294_v20  ;;  %v631_v29 = vmul.f32 %v470_v27, %v295_v21  ;;  %1697 = vmatprep.subr.bf16.mxu0 %v668_v23  ;;  %1475 = vperm.xlu0 %1848, %v1439_v22   ;;  %v313_v20 = vld [vmem:[%s2716_s0 + $0x128] sm:$0xff]  ;;  %v282_v26 = vld [vmem:[%s2716_s0 + $0x30] sm:$0xff]  ;;  %v283_v27 = vld [vmem:[%s2716_s0 + $0x38] sm:$0xff] }
  0x98   : > { %1460 = vperm.xlu1 %1849, %v1436_v24   ;;  %1698 = vmatpush3.bf16.msra.mxu0 %v660_v25 }
  0x99   : > { %v669_v33 = vpack.c.bf16 %v631_v29, %v630_v28 }
  0x9a   : > { %v535_v35 = vpop.permute.xlu0 %534  ;;  %v540_v36 = vpop.permute.xlu1 %539 }
  0x9b   : > { %v644_v37 = vmul.f32 %v535_v35, %v308_v30  ;;  %v645_v38 = vmul.f32 %v540_v36, %v309_v31  ;;  %1699 = vmatprep.subr.bf16.mxu0 %v669_v33  ;;  %1485 = vperm.xlu0 %1848, %v1441_v32   ;;  %v300_v33 = vld [vmem:[%s2716_s0 + $0xc0] sm:$0xff] }
  0x9c   : > { %1470 = vperm.xlu1 %1849, %v1438_v34   ;;  %v301_v34 = vld [vmem:[%s2716_s0 + $0xc8] sm:$0xff] }
  0x9d   : > { %v676_v42 = vpack.c.bf16 %v645_v38, %v644_v37 }
  0x9e   : > { %v385_v44 = vpop.permute.xlu0 %384  ;;  %v390_v45 = vpop.permute.xlu1 %389 }
  0x9f   : > { %v614_v46 = vmul.f32 %v385_v44, %v278_v39  ;;  %v615_v47 = vmul.f32 %v390_v45, %v279_v40  ;;  %1785 = vmatpush3.bf16.msra.mxu1 %v676_v42  ;;  %1495 = vperm.xlu0 %1848, %v1443_v41   ;;  %v314_v40 = vld [vmem:[%s2716_s0 + $0x130] sm:$0xff]  ;;  %v315_v41 = vld [vmem:[%s2716_s0 + $0x138] sm:$0xff] }
  0xa0   : > { %1480 = vperm.xlu1 %1849, %v1440_v43   ;;  %1786 = vmatprep.subr.bf16.mxu1 %v1931_v11 }
  0xa1   : > { %v661_v51 = vpack.c.bf16 %v615_v47, %v614_v46  ;;  %v284_v47 = vld [vmem:[%s2716_s0 + $0x40] sm:$0xff] }
  0xa2   : > { %v475_v53 = vpop.permute.xlu0 %474  ;;  %v480_v54 = vpop.permute.xlu1 %479 }
  0xa3   : > { %v632_v55 = vmul.f32 %v475_v53, %v296_v48  ;;  %v633_v56 = vmul.f32 %v480_v54, %v297_v49  ;;  %1700 = vmatpush3.bf16.msra.mxu0 %v661_v51  ;;  %1505 = vperm.xlu0 %1848, %v1445_v50   ;;  %v285_v48 = vld [vmem:[%s2716_s0 + $0x48] sm:$0xff]  ;;  %v302_v54 = vld [vmem:[%s2716_s0 + $0xd0] sm:$0xff] }
  0xa4   : > { %1490 = vperm.xlu1 %1849, %v1442_v52  }
  0xa5   : > { %v670_v60 = vpack.c.bf16 %v633_v56, %v632_v55  ;;  %v303_v55 = vld [vmem:[%s2716_s0 + $0xd8] sm:$0xff] }
  0xa6   : > { %v545_v62 = vpop.permute.xlu0 %544  ;;  %v550_v63 = vpop.permute.xlu1 %549 }
  0xa7   : > { %v646_v0 = vmul.f32 %v545_v62, %v310_v57  ;;  %v647_v1 = vmul.f32 %v550_v63, %v311_v58  ;;  %1701 = vmatprep.subr.bf16.mxu0 %v670_v60  ;;  %1515 = vperm.xlu0 %1848, %v1447_v59   ;;  %v317_v62 = vld [vmem:[%s2716_s0 + $0x148] sm:$0xff] }
  0xa8   : > { %1500 = vperm.xlu1 %1849, %v1444_v61   ;;  %v316_v61 = vld [vmem:[%s2716_s0 + $0x140] sm:$0xff] }
  0xa9   : > { %v677_v4 = vpack.c.bf16 %v647_v1, %v646_v0 }
  0xaa   : > { %v395_v6 = vpop.permute.xlu0 %394  ;;  %v400_v7 = vpop.permute.xlu1 %399 }
  0xab   : > { %v616_v8 = vmul.f32 %v395_v6, %v280_v2  ;;  %v617_v9 = vmul.f32 %v400_v7, %v281_v3  ;;  %1787 = vmatpush3.bf16.msra.mxu1 %v677_v4  ;;  %v286_v4 = vld [vmem:[%s2716_s0 + $0x50] sm:$0xff] }
  0xac   : > { %1510 = vperm.xlu1 %1849, %v1446_v5   ;;  %1788 = vmatprep.subr.bf16.mxu1 %v1931_v11  ;;  %v287_v5 = vld [vmem:[%s2716_s0 + $0x58] sm:$0xff] }
  0xad   : > { %v662_v13 = vpack.c.bf16 %v617_v9, %v616_v8 }
  0xae   : > { %v485_v15 = vpop.permute.xlu0 %484  ;;  %v490_v16 = vpop.permute.xlu1 %489 }
  0xaf   : > { %v634_v17 = vmul.f32 %v485_v15, %v298_v10  ;;  %v635_v18 = vmul.f32 %v490_v16, %v299_v12  ;;  %1702 = vmatpush3.bf16.msra.mxu0 %v662_v13  ;;  %v304_v12 = vld [vmem:[%s2716_s0 + $0xe0] sm:$0xff]  ;;  %v305_v13 = vld [vmem:[%s2716_s0 + $0xe8] sm:$0xff] }
  0xb0   : > { %1520 = vperm.xlu1 %1849, %v1448_v14  }
  0xb1   : > { %v671_v21 = vpack.c.bf16 %v635_v18, %v634_v17 }
  0xb2   : > { %v555_v22 = vpop.permute.xlu0 %554  ;;  %v560_v23 = vpop.permute.xlu1 %559 }
  0xb3   : > { %v648_v24 = vmul.f32 %v555_v22, %v312_v19  ;;  %v649_v25 = vmul.f32 %v560_v23, %v313_v20  ;;  %1703 = vmatprep.subr.bf16.mxu0 %v671_v21  ;;  %v318_v19 = vld [vmem:[%s2716_s0 + $0x150] sm:$0xff]  ;;  %v319_v20 = vld [vmem:[%s2716_s0 + $0x158] sm:$0xff] }
  0xb5   : > { %v678_v28 = vpack.c.bf16 %v649_v25, %v648_v24 }
  0xb6   : > { %v405_v29 = vpop.permute.xlu0 %404  ;;  %v410_v30 = vpop.permute.xlu1 %409 }
  0xb7   : > { %v618_v31 = vmul.f32 %v405_v29, %v282_v26  ;;  %v619_v32 = vmul.f32 %v410_v30, %v283_v27  ;;  %1789 = vmatpush3.bf16.msra.mxu1 %v678_v28  ;;  %v288_v26 = vld [vmem:[%s2716_s0 + $0x60] sm:$0xff]  ;;  %v289_v27 = vld [vmem:[%s2716_s0 + $0x68] sm:$0xff] }
  0xb8   : > { %1790 = vmatprep.subr.bf16.mxu1 %v1931_v11 }
  0xb9   : > { %v663_v35 = vpack.c.bf16 %v619_v32, %v618_v31 }
  0xba   : > { %v495_v36 = vpop.permute.xlu0 %494  ;;  %v500_v37 = vpop.permute.xlu1 %499 }
  0xbb   : > { %v636_v38 = vmul.f32 %v495_v36, %v300_v33  ;;  %v637_v39 = vmul.f32 %v500_v37, %v301_v34  ;;  %1704 = vmatpush3.bf16.msra.mxu0 %v663_v35  ;;  %v306_v33 = vld [vmem:[%s2716_s0 + $0xf0] sm:$0xff]  ;;  %v307_v34 = vld [vmem:[%s2716_s0 + $0xf8] sm:$0xff] }
  0xbd   : > { %v672_v42 = vpack.c.bf16 %v637_v39, %v636_v38 }
  0xbe   : > { %v565_v43 = vpop.permute.xlu0 %564  ;;  %v570_v44 = vpop.permute.xlu1 %569 }
  0xbf   : > { %v650_v45 = vmul.f32 %v565_v43, %v314_v40  ;;  %v651_v46 = vmul.f32 %v570_v44, %v315_v41  ;;  %1705 = vmatprep.subr.bf16.mxu0 %v672_v42  ;;  %v320_v40 = vld [vmem:[%s2716_s0 + $0x160] sm:$0xff]  ;;  %v321_v41 = vld [vmem:[%s2716_s0 + $0x168] sm:$0xff] }
  0xc1   : > { %v679_v49 = vpack.c.bf16 %v651_v46, %v650_v45 }
  0xc2   : > { %v415_v50 = vpop.permute.xlu0 %414  ;;  %v420_v51 = vpop.permute.xlu1 %419 }
  0xc3   : > { %v620_v52 = vmul.f32 %v415_v50, %v284_v47  ;;  %v621_v53 = vmul.f32 %v420_v51, %v285_v48  ;;  %1791 = vmatpush3.bf16.msra.mxu1 %v679_v49  ;;  %v290_v47 = vld [vmem:[%s2716_s0 + $0x70] sm:$0xff]  ;;  %v291_v48 = vld [vmem:[%s2716_s0 + $0x78] sm:$0xff] }
  0xc4   : > { %1792 = vmatprep.subr.bf16.mxu1 %v1931_v11 }
  0xc5   : > { %v664_v56 = vpack.c.bf16 %v621_v53, %v620_v52 }
  0xc6   : > { %v505_v57 = vpop.permute.xlu0 %504  ;;  %v510_v58 = vpop.permute.xlu1 %509 }
  0xc7   : > { %v638_v59 = vmul.f32 %v505_v57, %v302_v54  ;;  %v639_v60 = vmul.f32 %v510_v58, %v303_v55  ;;  %1706 = vmatpush3.bf16.msra.mxu0 %v664_v56  ;;  %v322_v54 = vld [vmem:[%s2716_s0 + $0x170] sm:$0xff]  ;;  %v323_v55 = vld [vmem:[%s2716_s0 + $0x178] sm:$0xff] }
  0xc9   : > { %v673_v63 = vpack.c.bf16 %v639_v60, %v638_v59  ;;  %v1850_v59 = vld [vmem:[%s2026_s7] ss:$12 sps:$4 sm:$0xff]  }
  0xca   : > { %v575_v0 = vpop.permute.xlu0 %574  ;;  %v580_v1 = vpop.permute.xlu1 %579 }
  0xcb   : > { %v652_v2 = vmul.f32 %v575_v0, %v316_v61  ;;  %v653_v3 = vmul.f32 %v580_v1, %v317_v62  ;;  %1707 = vmatprep.subr.bf16.mxu0 %v673_v63  ;;  %v1854_v62 = vld [vmem:[%s2026_s7 + $0x1c] ss:$12 sps:$4 sm:$0xff]   ;;  %v1856_v1 = vld [vmem:[%s2026_s7 + $0x18] ss:$12 sps:$4 sm:$0xff]  }
  0xcc   : > { %v1853_v0 = vld [vmem:[%s2026_s7 + $0x8] ss:$12 sps:$4 sm:$0xff]  }
  0xcd   : > { %v680_v6 = vpack.c.bf16 %v653_v3, %v652_v2  ;;  %v1858_v2 = vld [vmem:[%s2026_s7 + $0x34] ss:$12 sps:$4 sm:$0xff]  }
  0xce   : > { %v425_v7 = vpop.permute.xlu0 %424  ;;  %v430_v8 = vpop.permute.xlu1 %429  ;;  %v1857_v3 = vld [vmem:[%s2026_s7 + $0x20] ss:$12 sps:$4 sm:$0xff]  }
  0xcf   : > { %v622_v9 = vmul.f32 %v425_v7, %v286_v4  ;;  %v623_v10 = vmul.f32 %v430_v8, %v287_v5  ;;  %1793 = vmatpush3.bf16.msra.mxu1 %v680_v6  ;;  %v1860_v4 = vld [vmem:[%s2026_s7 + $0x30] ss:$12 sps:$4 sm:$0xff]   ;;  %v1862_v5 = vld [vmem:[%s2026_s7 + $0x4c] ss:$12 sps:$4 sm:$0xff]   ;;  %v1864_v7 = vld [vmem:[%s2026_s7 + $0x48] ss:$12 sps:$4 sm:$0xff]  }
  0xd0   : > { %1794 = vmatprep.subr.bf16.mxu1 %v1931_v11  ;;  %v1861_v6 = vld [vmem:[%s2026_s7 + $0x38] ss:$12 sps:$4 sm:$0xff]  }
  0xd1   : > { %v665_v14 = vpack.c.bf16 %v623_v10, %v622_v9  ;;  %v1866_v8 = vld [vmem:[%s2026_s7 + $0x64] ss:$12 sps:$4 sm:$0xff]   ;;  %v1868_v10 = vld [vmem:[%s2026_s7 + $0x60] ss:$12 sps:$4 sm:$0xff]  }
  0xd2   : > { %v515_v15 = vpop.permute.xlu0 %514  ;;  %v520_v16 = vpop.permute.xlu1 %519  ;;  %v1865_v9 = vld [vmem:[%s2026_s7 + $0x50] ss:$12 sps:$4 sm:$0xff]  }
  0xd3   : > { %v640_v17 = vmul.f32 %v515_v15, %v304_v12  ;;  %v641_v18 = vmul.f32 %v520_v16, %v305_v13  ;;  %1708 = vmatpush3.bf16.msra.mxu0 %v665_v14  ;;  %v1870_v12 = vld [vmem:[%s2026_s7 + $0x7c] ss:$12 sps:$4 sm:$0xff]   ;;  %v1872_v14 = vld [vmem:[%s2026_s7 + $0x78] ss:$12 sps:$4 sm:$0xff]   ;;  %v1874_v15 = vld [vmem:[%s2026_s7 + $0x94] ss:$12 sps:$4 sm:$0xff]  }
  0xd4   : > { %v1869_v13 = vld [vmem:[%s2026_s7 + $0x68] ss:$12 sps:$4 sm:$0xff]   ;;  %v1873_v16 = vld [vmem:[%s2026_s7 + $0x80] ss:$12 sps:$4 sm:$0xff]  }
  0xd5   : > { %v674_v21 = vpack.c.bf16 %v641_v18, %v640_v17  ;;  %v1876_v17 = vld [vmem:[%s2026_s7 + $0x90] ss:$12 sps:$4 sm:$0xff]   ;;  %v1878_v18 = vld [vmem:[%s2026_s7 + $0xac] ss:$12 sps:$4 sm:$0xff]  }
  0xd6   : > { %v585_v22 = vpop.permute.xlu0 %584  ;;  %v590_v23 = vpop.permute.xlu1 %589 }
  0xd7   : > { %v654_v24 = vmul.f32 %v585_v22, %v318_v19  ;;  %v655_v25 = vmul.f32 %v590_v23, %v319_v20  ;;  %1709 = vmatprep.subr.bf16.mxu0 %v674_v21  ;;  %v1877_v19 = vld [vmem:[%s2026_s7 + $0x98] ss:$12 sps:$4 sm:$0xff]   ;;  %v1880_v20 = vld [vmem:[%s2026_s7 + $0xa8] ss:$12 sps:$4 sm:$0xff]   ;;  %v1881_v22 = vld [vmem:[%s2026_s7 + $0xb0] ss:$12 sps:$4 sm:$0xff]  }
  0xd8   : > { %v1882_v21 = vld [vmem:[%s2026_s7 + $0xc4] ss:$12 sps:$4 sm:$0xff]   ;;  %v1884_v23 = vld [vmem:[%s2026_s7 + $0xc0] ss:$12 sps:$4 sm:$0xff]  }
  0xd9   : > { %v681_v28 = vpack.c.bf16 %v655_v25, %v654_v24  ;;  %v1885_v24 = vld [vmem:[%s2026_s7 + $0xc8] ss:$12 sps:$4 sm:$0xff]  }
  0xda   : > { %v435_v29 = vpop.permute.xlu0 %434  ;;  %v440_v30 = vpop.permute.xlu1 %439 }
  0xdb   : > { %v624_v31 = vmul.f32 %v435_v29, %v288_v26  ;;  %v625_v32 = vmul.f32 %v440_v30, %v289_v27  ;;  %1795 = vmatpush3.bf16.msra.mxu1 %v681_v28 }
  0xdc   : > { %1796 = vmatprep.subr.bf16.mxu1 %v1931_v11 }
  0xdd   : > { %v666_v35 = vpack.c.bf16 %v625_v32, %v624_v31 }
  0xde   : > { %v525_v36 = vpop.permute.xlu0 %524  ;;  %v530_v37 = vpop.permute.xlu1 %529 }
  0xdf   : > { %v642_v38 = vmul.f32 %v525_v36, %v306_v33  ;;  %v643_v39 = vmul.f32 %v530_v37, %v307_v34  ;;  %1710 = vmatpush3.bf16.msra.mxu0 %v666_v35 }
  0xe1   : > { %v675_v42 = vpack.c.bf16 %v643_v39, %v642_v38 }
  0xe2   : > { %v595_v43 = vpop.permute.xlu0 %594  ;;  %v600_v44 = vpop.permute.xlu1 %599 }
  0xe3   : > { %v656_v45 = vmul.f32 %v595_v43, %v320_v40  ;;  %v657_v46 = vmul.f32 %v600_v44, %v321_v41  ;;  %1711 = vmatprep.subr.bf16.mxu0 %v675_v42 }
  0xe5   : > { %v682_v49 = vpack.c.bf16 %v657_v46, %v656_v45 }
  0xe6   : > { %v445_v50 = vpop.permute.xlu0 %444  ;;  %v450_v51 = vpop.permute.xlu1 %449 }
  0xe7   : > { %v626_v52 = vmul.f32 %v445_v50, %v290_v47  ;;  %v627_v53 = vmul.f32 %v450_v51, %v291_v48  ;;  %1797 = vmatpush3.bf16.msra.mxu1 %v682_v49 }
  0xe8   : > { %1798 = vmatprep.subr.bf16.mxu1 %v1931_v11 }
  0xe9   : > { %v667_v56 = vpack.c.bf16 %v627_v53, %v626_v52 }
  0xea   : > { %v605_v57 = vpop.permute.xlu0 %604  ;;  %v610_v58 = vpop.permute.xlu1 %609 }
  0xeb   : > { %v658_v60 = vmul.f32 %v605_v57, %v322_v54  ;;  %v659_v61 = vmul.f32 %v610_v58, %v323_v55  ;;  %1712 = vmatpush3.bf16.msra.mxu0 %v667_v56 }
  0xed   : > { %v683_v63 = vpack.c.bf16 %v659_v61, %v658_v60 }
  0xee   : > { %897 = vmatmul.mubr.bf16.vlgmr.msra.gmra.mrb[0].mxu0 %v1850_v59 }
  0xef   : > { %1799 = vmatpush3.bf16.msra.mxu1 %v683_v63  ;;  %904 = vmatprep.mubr.bf16.mxu0 %v1854_v62 }
  0xf2   : > { %1801 = vmatmul.mubr.bf16.vlgmr.msra.gmra.mrb[0].mxu1 %v1853_v0 }
  0xf3   : > { %1804 = vmatprep.mubr.msk.bf16.mxu1 %vm1932_vm0, %v1931_v11 }
  0xf6   : > { %905 = vmatmul.mubr.bf16.gmra.mrb[4].mxu0 %v1856_v1 }
  0xf7   : > { %912 = vmatprep.mubr.bf16.mxu0 %v1858_v2 }
  0xfa   : > { %1805 = vmatmul.mubr.bf16.gmra.mrb[4].mxu1 %v1857_v3 }
  0xfb   : > { %1808 = vmatprep.mubr.msk.bf16.mxu1 %vm1932_vm0, %v1931_v11 }
  0xfe   : > { %913 = vmatmul.mubr.bf16.gmra.mrb[8].mxu0 %v1860_v4 }
  0xff   : > { %920 = vmatprep.mubr.bf16.mxu0 %v1862_v5 }
 0x102   : > { %1809 = vmatmul.mubr.bf16.gmra.mrb[8].mxu1 %v1861_v6 }
 0x103   : > { %1812 = vmatprep.mubr.msk.bf16.mxu1 %vm1932_vm0, %v1931_v11 }
 0x106   : > { %921 = vmatmul.mubr.bf16.gmra.mrb[12].mxu0 %v1864_v7 }
 0x107   : > { %928 = vmatprep.mubr.bf16.mxu0 %v1866_v8 }
 0x10a   : > { %1813 = vmatmul.mubr.bf16.gmra.mrb[12].mxu1 %v1865_v9 }
 0x10b   : > { %1816 = vmatprep.mubr.msk.bf16.mxu1 %vm1932_vm0, %v1931_v11 }
 0x10e   : > { %929 = vmatmul.mubr.bf16.gmra.mrb[16].mxu0 %v1868_v10 }
 0x10f   : > { %936 = vmatprep.mubr.bf16.mxu0 %v1870_v12 }
 0x112   : > { %1817 = vmatmul.mubr.bf16.gmra.mrb[16].mxu1 %v1869_v13 }
 0x113   : > { %1820 = vmatprep.mubr.msk.bf16.mxu1 %vm1932_vm0, %v1931_v11 }
 0x116   : > { %937 = vmatmul.mubr.bf16.gmra.mrb[20].mxu0 %v1872_v14 }
 0x117   : > { %944 = vmatprep.mubr.bf16.mxu0 %v1874_v15 }
 0x11a   : > { %1821 = vmatmul.mubr.bf16.gmra.mrb[20].mxu1 %v1873_v16 }
 0x11b   : > { %1824 = vmatprep.mubr.msk.bf16.mxu1 %vm1932_vm0, %v1931_v11 }
 0x11e   : > { %945 = vmatmul.mubr.bf16.gmra.mrb[24].mxu0 %v1876_v17 }
 0x11f   : > { %952 = vmatprep.mubr.bf16.mxu0 %v1878_v18 }
 0x122   : > { %1825 = vmatmul.mubr.bf16.gmra.mrb[24].mxu1 %v1877_v19 }
 0x123   : > { %1828 = vmatprep.mubr.msk.bf16.mxu1 %vm1932_vm0, %v1931_v11 }
 0x126   : > { %953 = vmatmul.mubr.bf16.gmra.mrb[28].mxu0 %v1880_v20 }
 0x127   : > { %960 = vmatprep.mubr.bf16.mxu0 %v1882_v21 }
 0x12a   : > { %1829 = vmatmul.mubr.bf16.gmra.mrb[28].mxu1 %v1881_v22 }
 0x12b   : > { %1832 = vmatprep.mubr.msk.bf16.mxu1 %vm1932_vm0, %v1931_v11 }
 0x12e   : > { %961 = vmatmul.mubr.bf16.gmra.mrb[32].mxu0 %v1884_v23 }
 0x132   : > { %1833 = vmatmul.mubr.bf16.gmra.mrb[32].mxu1 %v1885_v24 }
 0x1c1   : > { %v1713_v25 = vpop.f32.mrb[0].mxu0 }
 0x1c2   : > { %v1714_v26 = vpop.f32.mrb[1].mxu0 }
 0x1c3   : > { %v1715_v27 = vadd.f32 %v1714_v26, %v1713_v25  ;;  %v1716_v28 = vpop.f32.mrb[2].mxu0 }
 0x1c4   : > { %v1717_v29 = vpop.f32.mrb[3].mxu0 }
 0x1c5   : > { %v1718_v30 = vadd.f32 %v1717_v29, %v1716_v28  ;;  %v1003_v31 = vpop.f32.mrb[0].mxu1 }
 0x1c6   : > { %v2367_v32 = vadd.f32 %v1715_v27, %v1003_v31  ;;  %v1802_v33 = vpop.f32.mrb[1].mxu1 }
 0x1c7   : > { %v1006_v34 = vpop.f32.mrb[2].mxu1 }
 0x1c8   : > { %v2369_v35 = vadd.f32 %v1718_v30, %v1006_v34  ;;  %v1803_v36 = vpop.f32.mrb[3].mxu1  ;;  %v1075_v11 = vsel %vm1074_vm1, %v2367_v32, 0.0 }
 0x1c9   : > { %v1719_v37 = vpop.f32.mrb[4].mxu0  ;;  %1076 = vadd.xlane.f32.xlu0 %v1075_v11 }
 0x1ca   : > { %v1720_v38 = vpop.f32.mrb[5].mxu0  ;;  %v1078_v39 = vsel %vm1074_vm1, %v2369_v35, 0.0 }
 0x1cb   : > { %v1721_v40 = vadd.f32 %v1720_v38, %v1719_v37  ;;  %v1722_v41 = vpop.f32.mrb[6].mxu0  ;;  %1079 = vadd.xlane.f32.xlu1 %v1078_v39 }
 0x1cc   : > { %v1723_v42 = vpop.f32.mrb[7].mxu0 }
 0x1cd   : > { %v1724_v43 = vadd.f32 %v1723_v42, %v1722_v41  ;;  %v1011_v44 = vpop.f32.mrb[4].mxu1 }
 0x1ce   : > { %v2375_v45 = vadd.f32 %v1721_v40, %v1011_v44  ;;  %v1806_v46 = vpop.f32.mrb[5].mxu1 }
 0x1cf   : > { %v1014_v47 = vpop.f32.mrb[6].mxu1 }
 0x1d0   : > { %v2377_v48 = vadd.f32 %v1724_v43, %v1014_v47  ;;  %v1807_v49 = vpop.f32.mrb[7].mxu1  ;;  %v1081_v50 = vsel %vm1074_vm1, %v2375_v45, 0.0 }
 0x1d1   : > { %v1725_v51 = vpop.f32.mrb[8].mxu0  ;;  %1082 = vadd.xlane.f32.xlu0 %v1081_v50 }
 0x1d2   : > { %v1726_v52 = vpop.f32.mrb[9].mxu0  ;;  %v1084_v56 = vsel %vm1074_vm1, %v2377_v48, 0.0 }
 0x1d3   : > { %v1727_v53 = vadd.f32 %v1726_v52, %v1725_v51  ;;  %v1728_v54 = vpop.f32.mrb[10].mxu0  ;;  %v2415_v52 = vpop.permute.xlu1 %1329 }
 0x1d4   : > { %v1729_v55 = vpop.f32.mrb[11].mxu0 }
 0x1d5   : > { %v1730_v57 = vadd.f32 %v1729_v55, %v1728_v54  ;;  %v1019_v58 = vpop.f32.mrb[8].mxu1  ;;  %1085 = vadd.xlane.f32.xlu0 %v1084_v56 }
 0x1d6   : > { %v2383_v59 = vadd.f32 %v1727_v53, %v1019_v58  ;;  %v1810_v60 = vpop.f32.mrb[9].mxu1 }
 0x1d7   : > { %v1022_v61 = vpop.f32.mrb[10].mxu1 }
 0x1d8   : > { %v2385_v62 = vadd.f32 %v1730_v57, %v1022_v61  ;;  %v1811_v63 = vpop.f32.mrb[11].mxu1  ;;  %v1087_v0 = vsel %vm1074_vm1, %v2383_v59, 0.0 }
 0x1d9   : > { %v1731_v1 = vpop.f32.mrb[12].mxu0  ;;  %1088 = vadd.xlane.f32.xlu1 %v1087_v0 }
 0x1da   : > { %v1732_v2 = vpop.f32.mrb[13].mxu0  ;;  %v1090_v3 = vsel %vm1074_vm1, %v2385_v62, 0.0 }
 0x1db   : > { %v1733_v4 = vadd.f32 %v1732_v2, %v1731_v1  ;;  %v1734_v5 = vpop.f32.mrb[14].mxu0  ;;  %1091 = vadd.xlane.f32.xlu0 %v1090_v3  ;;  %v2423_v1 = vpop.permute.xlu1 %1339 }
 0x1dc   : > { %v1735_v6 = vpop.f32.mrb[15].mxu0 }
 0x1dd   : > { %v1736_v7 = vadd.f32 %v1735_v6, %v1734_v5  ;;  %v1027_v8 = vpop.f32.mrb[12].mxu1 }
 0x1de   : > { %v2391_v9 = vadd.f32 %v1733_v4, %v1027_v8  ;;  %v1814_v10 = vpop.f32.mrb[13].mxu1 }
 0x1df   : > { %v1030_v12 = vpop.f32.mrb[14].mxu1  ;;  %v2427_v10 = vpop.permute.xlu0 %1334 }
 0x1e0   : > { %v2393_v13 = vadd.f32 %v1736_v7, %v1030_v12  ;;  %v1815_v14 = vpop.f32.mrb[15].mxu1  ;;  %v1093_v15 = vsel %vm1074_vm1, %v2391_v9, 0.0 }
 0x1e1   : > { %v1737_v16 = vpop.f32.mrb[16].mxu0  ;;  %1094 = vadd.xlane.f32.xlu1 %v1093_v15 }
 0x1e2   : > { %v1738_v17 = vpop.f32.mrb[17].mxu0  ;;  %v1096_v18 = vsel %vm1074_vm1, %v2393_v13, 0.0 }
 0x1e3   : > { %v1739_v19 = vadd.f32 %v1738_v17, %v1737_v16  ;;  %v1740_v20 = vpop.f32.mrb[18].mxu0  ;;  %1097 = vadd.xlane.f32.xlu0 %v1096_v18  ;;  %v2431_v16 = vpop.permute.xlu1 %1344 }
 0x1e4   : > { %v1741_v21 = vpop.f32.mrb[19].mxu0 }
 0x1e5   : > { %v1742_v22 = vadd.f32 %v1741_v21, %v1740_v20  ;;  %v1035_v23 = vpop.f32.mrb[16].mxu1 }
 0x1e6   : > { %v2399_v24 = vadd.f32 %v1739_v19, %v1035_v23  ;;  %v1818_v25 = vpop.f32.mrb[17].mxu1 }
 0x1e7   : > { %v1038_v26 = vpop.f32.mrb[18].mxu1 }
 0x1e8   : > { %v2401_v27 = vadd.f32 %v1742_v22, %v1038_v26  ;;  %v1819_v28 = vpop.f32.mrb[19].mxu1  ;;  %v1099_v29 = vsel %vm1074_vm1, %v2399_v24, 0.0  ;;  %v2439_v26 = vpop.permute.xlu0 %1349 }
 0x1e9   : > { %v1743_v30 = vpop.f32.mrb[20].mxu0  ;;  %1100 = vadd.xlane.f32.xlu1 %v1099_v29 }
 0x1ea   : > { %v1744_v31 = vpop.f32.mrb[21].mxu0  ;;  %v1102_v33 = vsel %vm1074_vm1, %v2401_v27, 0.0 }
 0x1eb   : > { %v1745_v34 = vadd.f32 %v1744_v31, %v1743_v30  ;;  %v1746_v36 = vpop.f32.mrb[22].mxu0  ;;  %1103 = vadd.xlane.f32.xlu0 %v1102_v33  ;;  %v2441_v31 = vpop.permute.xlu1 %1354 }
 0x1ec   : > { %v1747_v11 = vpop.f32.mrb[23].mxu0 }
 0x1ed   : > { %v1748_v37 = vadd.f32 %v1747_v11, %v1746_v36  ;;  %v1043_v38 = vpop.f32.mrb[20].mxu1 }
 0x1ee   : > { %v2407_v39 = vadd.f32 %v1745_v34, %v1043_v38  ;;  %v1822_v40 = vpop.f32.mrb[21].mxu1 }
 0x1ef   : > { %v1046_v41 = vpop.f32.mrb[22].mxu1  ;;  %v2449_v40 = vpop.permute.xlu0 %1359 }
 0x1f0   : > { %v2409_v42 = vadd.f32 %v1748_v37, %v1046_v41  ;;  %v1823_v43 = vpop.f32.mrb[23].mxu1  ;;  %v1105_v44 = vsel %vm1074_vm1, %v2407_v39, 0.0 }
 0x1f1   : > { %v1749_v46 = vpop.f32.mrb[24].mxu0  ;;  %1106 = vadd.xlane.f32.xlu1 %v1105_v44  ;;  %v2453_v43 = vpop.permute.xlu1 %1364 }
 0x1f2   : > { %v1750_v47 = vpop.f32.mrb[25].mxu0  ;;  %v1108_v49 = vsel %vm1074_vm1, %v2409_v42, 0.0 }
 0x1f3   : > { %v1751_v50 = vadd.f32 %v1750_v47, %v1749_v46  ;;  %v1752_v51 = vpop.f32.mrb[26].mxu0  ;;  %1109 = vadd.xlane.f32.xlu0 %v1108_v49  ;;  %v2455_v44 = vpop.permute.xlu0 %1369  ;;  %v1450_v49 = vld [vmem:[%s2156_s11 + $0x78] sm:$0xff] }
 0x1f4   : > { %v1753_v53 = vpop.f32.mrb[27].mxu0 }
 0x1f5   : > { %v1754_v54 = vadd.f32 %v1753_v53, %v1752_v51  ;;  %v1051_v55 = vpop.f32.mrb[24].mxu1  ;;  %v2457_v46 = vpop.permute.xlu1 %1374 }
 0x1f6   : > { %v2417_v56 = vadd.f32 %v1751_v50, %v1051_v55  ;;  %v1826_v57 = vpop.f32.mrb[25].mxu1 }
 0x1f7   : > { %v1054_v58 = vpop.f32.mrb[26].mxu1  ;;  %v2459_v47 = vpop.permute.xlu0 %1379 }
 0x1f8   : > { %v2419_v60 = vadd.f32 %v1754_v54, %v1054_v58  ;;  %v1827_v61 = vpop.f32.mrb[27].mxu1  ;;  %v1111_v63 = vsel %vm1074_vm1, %v2417_v56, 0.0  ;;  %v1449_v54 = vld [vmem:[%s2156_s11 + $0x70] sm:$0xff] }
 0x1f9   : > { %v1755_v0 = vpop.f32.mrb[28].mxu0  ;;  %1112 = vadd.xlane.f32.xlu1 %v1111_v63  ;;  %v2462_v50 = vpop.permute.xlu1 %1384 }
 0x1fa   : > { %v1756_v2 = vpop.f32.mrb[29].mxu0  ;;  %v1114_v3 = vsel %vm1074_vm1, %v2419_v60, 0.0 }
 0x1fb   : > { %v1757_v4 = vadd.f32 %v1756_v2, %v1755_v0  ;;  %v1758_v5 = vpop.f32.mrb[30].mxu0  ;;  %1115 = vadd.xlane.f32.xlu0 %v1114_v3  ;;  %v2464_v51 = vpop.permute.xlu0 %1389 }
 0x1fc   : > { %v1759_v6 = vpop.f32.mrb[31].mxu0 }
 0x1fd   : > { %v1760_v7 = vadd.f32 %v1759_v6, %v1758_v5  ;;  %v1059_v8 = vpop.f32.mrb[28].mxu1  ;;  %v2466_v53 = vpop.permute.xlu1 %1394 }
 0x1fe   : > { %v2429_v12 = vadd.f32 %v1757_v4, %v1059_v8  ;;  %v1830_v14 = vpop.f32.mrb[29].mxu1 }
 0x1ff   : > { %v1062_v15 = vpop.f32.mrb[30].mxu1  ;;  %v2469_v55 = vpop.permute.xlu0 %1399 }
 0x200   : > { %v2433_v17 = vadd.f32 %v1760_v7, %v1062_v15  ;;  %v1831_v18 = vpop.f32.mrb[31].mxu1  ;;  %v1117_v19 = vsel %vm1074_vm1, %v2429_v12, 0.0 }
 0x201   : > { %v1761_v20 = vpop.f32.mrb[32].mxu0  ;;  %1118 = vadd.xlane.f32.xlu1 %v1117_v19  ;;  %v2471_v57 = vpop.permute.xlu1 %1404 }
 0x202   : > { %v1762_v21 = vpop.f32.mrb[33].mxu0  ;;  %v1120_v22 = vsel %vm1074_vm1, %v2433_v17, 0.0 }
 0x203   : > { %v1763_v23 = vadd.f32 %v1762_v21, %v1761_v20  ;;  %v1764_v25 = vpop.f32.mrb[34].mxu0  ;;  %1121 = vadd.xlane.f32.xlu0 %v1120_v22  ;;  %v2473_v58 = vpop.permute.xlu0 %1409 }
 0x204   : > { %v1765_v28 = vpop.f32.mrb[35].mxu0  ;;  %2724 = vst [vmem:[#allocation2_spill] sm:$0xff] %v2473_v58 }
 0x205   : > { %v1766_v29 = vadd.f32 %v1765_v28, %v1764_v25  ;;  %v1067_v30 = vpop.f32.mrb[32].mxu1  ;;  %v2475_v61 = vpop.permute.xlu1 %1414 }
 0x206   : > { %v2443_v33 = vadd.f32 %v1763_v23, %v1067_v30  ;;  %v1834_v34 = vpop.f32.mrb[33].mxu1  ;;  %2725 = vst [vmem:[#allocation3_spill] sm:$0xff] %v2475_v61 }
 0x207   : > { %v1070_v36 = vpop.f32.mrb[34].mxu1  ;;  %v2477_v63 = vpop.permute.xlu0 %1455 }
 0x208   : > { %v2445_v11 = vadd.f32 %v1766_v29, %v1070_v36  ;;  %v1835_v37 = vpop.f32.mrb[35].mxu1  ;;  %v1123_v38 = vsel %vm1074_vm1, %v2443_v33, 0.0 }
 0x209   : > { %1124 = vadd.xlane.f32.xlu1 %v1123_v38  ;;  %v2479_v0 = vpop.permute.xlu1 %1460 }
 0x20a   : > { %v1126_v41 = vsel %vm1074_vm1, %v2445_v11, 0.0 }
 0x20b   : > { %1127 = vadd.xlane.f32.xlu0 %v1126_v41  ;;  %v2481_v2 = vpop.permute.xlu0 %1465 }
 0x20d   : > { %v2483_v3 = vpop.permute.xlu1 %1470 }
 0x20f   : > { %v2485_v4 = vpop.permute.xlu0 %1475 }
 0x211   : > { %v2487_v5 = vpop.permute.xlu1 %1480 }
 0x213   : > { %v2489_v6 = vpop.permute.xlu0 %1485 }
 0x215   : > { %v2491_v7 = vpop.permute.xlu1 %1490 }
 0x217   : > { %v2493_v8 = vpop.permute.xlu0 %1495 }
 0x219   : > { %v2495_v14 = vpop.permute.xlu1 %1500 }
 0x21a   : > { %1530 = vperm.xlu1 %1849, %v1450_v49  }
 0x21b   : > { %v2497_v15 = vpop.permute.xlu0 %1505 }
 0x21d   : > { %v2499_v18 = vpop.permute.xlu1 %1510 }
 0x21f   : > { %v2501_v19 = vpop.permute.xlu0 %1515 }
 0x221   : > { %1525 = vperm.xlu0 %1848, %v1449_v54   ;;  %v2503_v20 = vpop.permute.xlu1 %1520 }
 0x256   : > { %v1077_v21 = vpop.xlane.xlu0 %1076 }
 0x257   : > { %v1129_v22 = vmul.f32 0.020408163, %v1077_v21 }
 0x258   : > { %v1080_v23 = vpop.xlane.xlu1 %1079 }
 0x259   : > { %v2506_v25 = vsub.f32 %v2367_v32, %v1129_v22  ;;  %v1130_v28 = vmul.f32 0.020408163, %v1080_v23 }
 0x25b   : > { %v2509_v29 = vsub.f32 %v2369_v35, %v1130_v28  ;;  %v1165_v30 = vmul.f32 %v2506_v25, %v2506_v25 }
 0x25d   : > { %v1183_v34 = vsel %vm1074_vm1, %v1165_v30, 0.0  ;;  %v1166_v36 = vmul.f32 %v2509_v29, %v2509_v29 }
 0x25e   : > { %1184 = vadd.xlane.f32.xlu1 %v1183_v34  ;;  %v1083_v37 = vpop.xlane.xlu0 %1082 }
 0x25f   : > { %v1131_v38 = vmul.f32 0.020408163, %v1083_v37  ;;  %v1186_v41 = vsel %vm1074_vm1, %v1166_v36, 0.0 }
 0x260   : > { %1187 = vadd.xlane.f32.xlu0 %v1186_v41 }
 0x261   : > { %v2518_v32 = vsub.f32 %v2375_v45, %v1131_v38 }
 0x262   : > { %v1086_v49 = vpop.xlane.xlu0 %1085 }
 0x263   : > { %v1132_v35 = vmul.f32 0.020408163, %v1086_v49  ;;  %v1167_v54 = vmul.f32 %v2518_v32, %v2518_v32 }
 0x265   : > { %v2523_v21 = vsub.f32 %v2377_v48, %v1132_v35  ;;  %v1189_v22 = vsel %vm1074_vm1, %v1167_v54, 0.0 }
 0x266   : > { %v1089_v23 = vpop.xlane.xlu1 %1088  ;;  %1190 = vadd.xlane.f32.xlu1 %v1189_v22 }
 0x267   : > { %v1133_v28 = vmul.f32 0.020408163, %v1089_v23  ;;  %v1168_v30 = vmul.f32 %v2523_v21, %v2523_v21 }
 0x268   : > { %v1092_v34 = vpop.xlane.xlu0 %1091 }
 0x269   : > { %v2529_v45 = vsub.f32 %v2383_v59, %v1133_v28  ;;  %v1134_v36 = vmul.f32 0.020408163, %v1092_v34  ;;  %v1192_v37 = vsel %vm1074_vm1, %v1168_v30, 0.0 }
 0x26a   : > { %1193 = vadd.xlane.f32.xlu0 %v1192_v37 }
 0x26b   : > { %v2533_v38 = vsub.f32 %v2385_v62, %v1134_v36  ;;  %v1169_v48 = vmul.f32 %v2529_v45, %v2529_v45 }
 0x26d   : > { %v1195_v41 = vsel %vm1074_vm1, %v1169_v48, 0.0  ;;  %v1170_v49 = vmul.f32 %v2533_v38, %v2533_v38 }
 0x26e   : > { %v1095_v35 = vpop.xlane.xlu1 %1094  ;;  %1196 = vadd.xlane.f32.xlu1 %v1195_v41 }
 0x26f   : > { %v1135_v54 = vmul.f32 0.020408163, %v1095_v35  ;;  %v1198_v59 = vsel %vm1074_vm1, %v1170_v49, 0.0 }
 0x270   : > { %1199 = vadd.xlane.f32.xlu0 %v1198_v59  ;;  %v1098_v22 = vpop.xlane.xlu0 %1097 }
 0x271   : > { %v2542_v23 = vsub.f32 %v2391_v9, %v1135_v54  ;;  %v1136_v62 = vmul.f32 0.020408163, %v1098_v22 }
 0x273   : > { %v2545_v28 = vsub.f32 %v2393_v13, %v1136_v62  ;;  %v1171_v30 = vmul.f32 %v2542_v23, %v2542_v23 }
 0x275   : > { %v1201_v34 = vsel %vm1074_vm1, %v1171_v30, 0.0  ;;  %v1172_v36 = vmul.f32 %v2545_v28, %v2545_v28 }
 0x276   : > { %v1101_v37 = vpop.xlane.xlu1 %1100  ;;  %1202 = vadd.xlane.f32.xlu1 %v1201_v34 }
 0x277   : > { %v1137_v48 = vmul.f32 0.020408163, %v1101_v37  ;;  %v1204_v41 = vsel %vm1074_vm1, %v1172_v36, 0.0 }
 0x278   : > { %1205 = vadd.xlane.f32.xlu0 %v1204_v41  ;;  %v1104_v9 = vpop.xlane.xlu0 %1103 }
 0x279   : > { %v2554_v49 = vsub.f32 %v2399_v24, %v1137_v48  ;;  %v1138_v13 = vmul.f32 0.020408163, %v1104_v9 }
 0x27b   : > { %v2557_v35 = vsub.f32 %v2401_v27, %v1138_v13  ;;  %v1173_v54 = vmul.f32 %v2554_v49, %v2554_v49 }
 0x27d   : > { %v1207_v59 = vsel %vm1074_vm1, %v1173_v54, 0.0  ;;  %v1174_v22 = vmul.f32 %v2557_v35, %v2557_v35 }
 0x27e   : > { %v1107_v62 = vpop.xlane.xlu1 %1106  ;;  %1208 = vadd.xlane.f32.xlu1 %v1207_v59 }
 0x27f   : > { %v1139_v30 = vmul.f32 0.020408163, %v1107_v62  ;;  %v1210_v34 = vsel %vm1074_vm1, %v1174_v22, 0.0 }
 0x280   : > { %1211 = vadd.xlane.f32.xlu0 %v1210_v34  ;;  %v1110_v24 = vpop.xlane.xlu0 %1109 }
 0x281   : > { %v2566_v36 = vsub.f32 %v2407_v39, %v1139_v30  ;;  %v1140_v27 = vmul.f32 0.020408163, %v1110_v24 }
 0x283   : > { %v2569_v37 = vsub.f32 %v2409_v42, %v1140_v27  ;;  %v1175_v48 = vmul.f32 %v2566_v36, %v2566_v36 }
 0x285   : > { %v1213_v41 = vsel %vm1074_vm1, %v1175_v48, 0.0  ;;  %v1176_v9 = vmul.f32 %v2569_v37, %v2569_v37 }
 0x286   : > { %v1113_v13 = vpop.xlane.xlu1 %1112  ;;  %1214 = vadd.xlane.f32.xlu1 %v1213_v41 }
 0x287   : > { %v1141_v54 = vmul.f32 0.020408163, %v1113_v13  ;;  %v1216_v59 = vsel %vm1074_vm1, %v1176_v9, 0.0 }
 0x288   : > { %1217 = vadd.xlane.f32.xlu0 %v1216_v59  ;;  %v1116_v39 = vpop.xlane.xlu0 %1115 }
 0x289   : > { %v2578_v22 = vsub.f32 %v2417_v56, %v1141_v54  ;;  %v1142_v42 = vmul.f32 0.020408163, %v1116_v39 }
 0x28b   : > { %v2581_v62 = vsub.f32 %v2419_v60, %v1142_v42  ;;  %v1177_v30 = vmul.f32 %v2578_v22, %v2578_v22 }
 0x28d   : > { %v1219_v34 = vsel %vm1074_vm1, %v1177_v30, 0.0  ;;  %v1178_v24 = vmul.f32 %v2581_v62, %v2581_v62 }
 0x28e   : > { %v1119_v27 = vpop.xlane.xlu1 %1118  ;;  %1220 = vadd.xlane.f32.xlu1 %v1219_v34 }
 0x28f   : > { %v1143_v48 = vmul.f32 0.020408163, %v1119_v27  ;;  %v1222_v41 = vsel %vm1074_vm1, %v1178_v24, 0.0 }
 0x290   : > { %1223 = vadd.xlane.f32.xlu0 %v1222_v41  ;;  %v1122_v56 = vpop.xlane.xlu0 %1121 }
 0x291   : > { %v2590_v9 = vsub.f32 %v2429_v12, %v1143_v48  ;;  %v1144_v60 = vmul.f32 0.020408163, %v1122_v56 }
 0x293   : > { %v2593_v13 = vsub.f32 %v2433_v17, %v1144_v60  ;;  %v1179_v54 = vmul.f32 %v2590_v9, %v2590_v9 }
 0x295   : > { %v1225_v59 = vsel %vm1074_vm1, %v1179_v54, 0.0  ;;  %v1180_v39 = vmul.f32 %v2593_v13, %v2593_v13  ;;  %v1452_v54 = vld [vmem:[%s2156_s11 + $0x88] sm:$0xff] }
 0x296   : > { %v1125_v42 = vpop.xlane.xlu1 %1124  ;;  %1226 = vadd.xlane.f32.xlu1 %v1225_v59 }
 0x297   : > { %v1145_v30 = vmul.f32 0.020408163, %v1125_v42  ;;  %v1228_v12 = vsel %vm1074_vm1, %v1180_v39, 0.0 }
 0x298   : > { %1229 = vadd.xlane.f32.xlu0 %v1228_v12  ;;  %v1128_v34 = vpop.xlane.xlu0 %1127 }
 0x299   : > { %v2602_v17 = vsub.f32 %v2443_v33, %v1145_v30  ;;  %v1146_v24 = vmul.f32 0.020408163, %v1128_v34  ;;  %v1451_v33 = vld [vmem:[%s2156_s11 + $0x80] sm:$0xff] }
 0x29a   : > { %v2615_v59 = vpop.permute.xlu1 %1530 }
 0x29b   : > { %2726 = vst [vmem:[#allocation4_spill] sm:$0xff] %v2602_v17  ;;  %v2605_v27 = vsub.f32 %v2445_v11, %v1146_v24  ;;  %v1181_v48 = vmul.f32 %v2602_v17, %v2602_v17 }
 0x29d   : > { %2727 = vst [vmem:[#allocation5_spill] sm:$0xff] %v2605_v27  ;;  %v1231_v41 = vsel %vm1074_vm1, %v1181_v48, 0.0  ;;  %v1182_v56 = vmul.f32 %v2605_v27, %v2605_v27 }
 0x29e   : > { %1232 = vadd.xlane.f32.xlu1 %v1231_v41 }
 0x29f   : > { %v1234_v60 = vsel %vm1074_vm1, %v1182_v56, 0.0 }
 0x2a0   : > { %1235 = vadd.xlane.f32.xlu0 %v1234_v60  ;;  %v2617_v11 = vpop.permute.xlu0 %1525 }
 0x2af   : > { %1540 = vperm.xlu1 %1849, %v1452_v54  }
 0x2b6   : > { %1535 = vperm.xlu0 %1848, %v1451_v33  }
 0x2eb   : > { %v1185_v39 = vpop.xlane.xlu1 %1184 }
 0x2ec   : > { %v1237_v42 = vmul.f32 0.020408163, %v1185_v39 }
 0x2ed   : > { %v1188_v30 = vpop.xlane.xlu0 %1187 }
 0x2ee   : > { %v1255_v12 = vadd.f32 1e-05, %v1237_v42  ;;  %v1238_v34 = vmul.f32 0.020408163, %v1188_v30 }
 0x2f0   : > { %1886 = vrsqrt.f32 %v1255_v12  ;;  %v1256_v24 = vadd.f32 1e-05, %v1238_v34 }
 0x2f2   : > { %1888 = vrsqrt.f32 %v1256_v24 }
 0x2f3   : > { %v1191_v48 = vpop.xlane.xlu1 %1190 }
 0x2f4   : > { %v1239_v41 = vmul.f32 0.020408163, %v1191_v48 }
 0x2f6   : > { %v1257_v56 = vadd.f32 1e-05, %v1239_v41 }
 0x2f7   : > { %v1194_v60 = vpop.xlane.xlu0 %1193 }
 0x2f8   : > { %1890 = vrsqrt.f32 %v1257_v56  ;;  %v1240_v54 = vmul.f32 0.020408163, %v1194_v60 }
 0x2fa   : > { %v1887_v33 = vpop.eup %1886  ;;  %v1258_v61 = vadd.f32 1e-05, %v1240_v54 }
 0x2fb   : > { %v1291_v58 = vmul.f32 %v1887_v33, %v2506_v25  ;;  %v1197_v27 = vpop.xlane.xlu1 %1196 }
 0x2fc   : > { %v1889_v17 = vpop.eup %1888  ;;  %1892 = vrsqrt.f32 %v1258_v61  ;;  %v1241_v39 = vmul.f32 0.020408163, %v1197_v27 }
 0x2fd   : > { %v1417_v42 = vmul.f32 %v2415_v52, %v1291_v58  ;;  %v1292_v30 = vmul.f32 %v1889_v17, %v2509_v29  ;;  %v1200_v12 = vpop.xlane.xlu0 %1199 }
 0x2fe   : > { %v1259_v34 = vadd.f32 1e-05, %v1241_v39  ;;  %v1242_v24 = vmul.f32 0.020408163, %v1200_v12 }
 0x2ff   : > { %v1543_v25 = vadd.f32 %v2477_v63, %v1417_v42  ;;  %v1418_v48 = vmul.f32 %v2427_v10, %v1292_v30 }
 0x300   : > { %1894 = vrsqrt.f32 %v1259_v34  ;;  %v1260_v61 = vadd.f32 1e-05, %v1242_v24 }
 0x301   : > { %1561 = vst.msk [vmem:[%s2626_s27] sm:$0xff] %vm1074_vm1, %v1543_v25  ;;  %v1544_v52 = vadd.f32 %v2479_v0, %v1418_v48 }
 0x302   : > { %v1891_v58 = vpop.eup %1890  ;;  %1896 = vrsqrt.f32 %v1260_v61 }
 0x303   : > { %1562 = vst.msk [vmem:[%s2626_s27 + $0x8] sm:$0xff] %vm1074_vm1, %v1544_v52  ;;  %v1293_v29 = vmul.f32 %v1891_v58, %v2518_v32  ;;  %v1203_v17 = vpop.xlane.xlu1 %1202 }
 0x304   : > { %v1243_v27 = vmul.f32 0.020408163, %v1203_v17 }
 0x305   : > { %v1419_v41 = vmul.f32 %v2423_v1, %v1293_v29  ;;  %v1206_v63 = vpop.xlane.xlu0 %1205 }
 0x306   : > { %v1893_v56 = vpop.eup %1892  ;;  %v1261_v10 = vadd.f32 1e-05, %v1243_v27  ;;  %v1244_v60 = vmul.f32 0.020408163, %v1206_v63 }
 0x307   : > { %v1545_v54 = vadd.f32 %v2481_v2, %v1419_v41  ;;  %v1294_v0 = vmul.f32 %v1893_v56, %v2523_v21 }
 0x308   : > { %1898 = vrsqrt.f32 %v1261_v10  ;;  %v1262_v33 = vadd.f32 1e-05, %v1244_v60 }
 0x309   : > { %1563 = vst.msk [vmem:[%s2626_s27 + $0x10] sm:$0xff] %vm1074_vm1, %v1545_v54  ;;  %v1420_v39 = vmul.f32 %v2431_v16, %v1294_v0 }
 0x30a   : > { %v1895_v32 = vpop.eup %1894  ;;  %1900 = vrsqrt.f32 %v1262_v33 }
 0x30b   : > { %v1546_v1 = vadd.f32 %v2483_v3, %v1420_v39  ;;  %v1295_v42 = vmul.f32 %v1895_v32, %v2529_v45  ;;  %v1209_v30 = vpop.xlane.xlu1 %1208 }
 0x30c   : > { %v1897_v12 = vpop.eup %1896  ;;  %v1245_v34 = vmul.f32 0.020408163, %v1209_v30 }
 0x30d   : > { %1564 = vst.msk [vmem:[%s2626_s27 + $0x18] sm:$0xff] %vm1074_vm1, %v1546_v1  ;;  %v1421_v2 = vmul.f32 %v2439_v26, %v1295_v42  ;;  %v1296_v21 = vmul.f32 %v1897_v12, %v2533_v38  ;;  %v1212_v24 = vpop.xlane.xlu0 %1211 }
 0x30e   : > { %v1263_v25 = vadd.f32 1e-05, %v1245_v34  ;;  %v1246_v16 = vmul.f32 0.020408163, %v1212_v24 }
 0x30f   : > { %v1547_v48 = vadd.f32 %v2485_v4, %v1421_v2  ;;  %v1422_v61 = vmul.f32 %v2441_v31, %v1296_v21 }
 0x310   : > { %1902 = vrsqrt.f32 %v1263_v25  ;;  %v1264_v3 = vadd.f32 1e-05, %v1246_v16 }
 0x311   : > { %1565 = vst.msk [vmem:[%s2626_s27 + $0x20] sm:$0xff] %vm1074_vm1, %v1547_v48  ;;  %v1548_v45 = vadd.f32 %v2487_v5, %v1422_v61 }
 0x312   : > { %v1899_v52 = vpop.eup %1898  ;;  %1904 = vrsqrt.f32 %v1264_v3 }
 0x313   : > { %1566 = vst.msk [vmem:[%s2626_s27 + $0x28] sm:$0xff] %vm1074_vm1, %v1548_v45  ;;  %v1297_v26 = vmul.f32 %v1899_v52, %v2542_v23  ;;  %v1215_v38 = vpop.xlane.xlu1 %1214 }
 0x314   : > { %v1901_v58 = vpop.eup %1900  ;;  %v1247_v29 = vmul.f32 0.020408163, %v1215_v38 }
 0x315   : > { %v1423_v4 = vmul.f32 %v2449_v40, %v1297_v26  ;;  %v1298_v31 = vmul.f32 %v1901_v58, %v2545_v28  ;;  %v1218_v17 = vpop.xlane.xlu0 %1217 }
 0x316   : > { %v1265_v27 = vadd.f32 1e-05, %v1247_v29  ;;  %v1248_v41 = vmul.f32 0.020408163, %v1218_v17  ;;  %v2728_v17 = vld [vmem:[#allocation4_spill] sm:$0xff] }
 0x317   : > { %v1549_v5 = vadd.f32 %v2489_v6, %v1423_v4  ;;  %v1424_v63 = vmul.f32 %v2453_v43, %v1298_v31 }
 0x318   : > { %1906 = vrsqrt.f32 %v1265_v27  ;;  %v1266_v56 = vadd.f32 1e-05, %v1248_v41  ;;  %v2729_v41 = vld [vmem:[#allocation5_spill] sm:$0xff] }
 0x319   : > { %1567 = vst.msk [vmem:[%s2626_s27 + $0x30] sm:$0xff] %vm1074_vm1, %v1549_v5  ;;  %v1550_v23 = vadd.f32 %v2491_v7, %v1424_v63  ;;  %v2730_v5 = vld [vmem:[#allocation2_spill] sm:$0xff] }
 0x31a   : > { %v1903_v10 = vpop.eup %1902  ;;  %1908 = vrsqrt.f32 %v1266_v56  ;;  %v2731_v56 = vld [vmem:[#allocation3_spill] sm:$0xff] }
 0x31b   : > { %1568 = vst.msk [vmem:[%s2626_s27 + $0x38] sm:$0xff] %vm1074_vm1, %v1550_v23  ;;  %v1299_v40 = vmul.f32 %v1903_v10, %v2554_v49  ;;  %v1221_v28 = vpop.xlane.xlu1 %1220 }
 0x31c   : > { %v1905_v60 = vpop.eup %1904  ;;  %v1249_v54 = vmul.f32 0.020408163, %v1221_v28 }
 0x31d   : > { %v1425_v6 = vmul.f32 %v2455_v44, %v1299_v40  ;;  %v1300_v43 = vmul.f32 %v1905_v60, %v2557_v35  ;;  %v1224_v0 = vpop.xlane.xlu0 %1223 }
 0x31e   : > { %v1267_v33 = vadd.f32 1e-05, %v1249_v54  ;;  %v1250_v39 = vmul.f32 0.020408163, %v1224_v0 }
 0x31f   : > { %v1551_v7 = vadd.f32 %v2493_v8, %v1425_v6  ;;  %v1426_v32 = vmul.f32 %v2457_v46, %v1300_v43 }
 0x320   : > { %1910 = vrsqrt.f32 %v1267_v33  ;;  %v1268_v1 = vadd.f32 1e-05, %v1250_v39 }
 0x321   : > { %1569 = vst.msk [vmem:[%s2626_s27 + $0x40] sm:$0xff] %vm1074_vm1, %v1551_v7  ;;  %v1552_v49 = vadd.f32 %v2495_v14, %v1426_v32 }
 0x322   : > { %v1907_v42 = vpop.eup %1906  ;;  %1912 = vrsqrt.f32 %v1268_v1 }
 0x323   : > { %1570 = vst.msk [vmem:[%s2626_s27 + $0x48] sm:$0xff] %vm1074_vm1, %v1552_v49  ;;  %v1301_v44 = vmul.f32 %v1907_v42, %v2566_v36  ;;  %v1227_v35 = vpop.xlane.xlu1 %1226 }
 0x324   : > { %v1909_v30 = vpop.eup %1908  ;;  %v1251_v12 = vmul.f32 0.020408163, %v1227_v35 }
 0x325   : > { %v1427_v8 = vmul.f32 %v2459_v47, %v1301_v44  ;;  %v1302_v46 = vmul.f32 %v1909_v30, %v2569_v37  ;;  %v1230_v34 = vpop.xlane.xlu0 %1229 }
 0x326   : > { %v1269_v2 = vadd.f32 1e-05, %v1251_v12  ;;  %v1252_v21 = vmul.f32 0.020408163, %v1230_v34 }
 0x327   : > { %v1553_v14 = vadd.f32 %v2497_v15, %v1427_v8  ;;  %v1428_v24 = vmul.f32 %v2462_v50, %v1302_v46 }
 0x328   : > { %1914 = vrsqrt.f32 %v1269_v2  ;;  %v1270_v25 = vadd.f32 1e-05, %v1252_v21 }
 0x329   : > { %1571 = vst.msk [vmem:[%s2626_s27 + $0x50] sm:$0xff] %vm1074_vm1, %v1553_v14  ;;  %v1554_v36 = vadd.f32 %v2499_v18, %v1428_v24 }
 0x32a   : > { %v1911_v16 = vpop.eup %1910  ;;  %1916 = vrsqrt.f32 %v1270_v25 }
 0x32b   : > { %1572 = vst.msk [vmem:[%s2626_s27 + $0x58] sm:$0xff] %vm1074_vm1, %v1554_v36  ;;  %v1303_v47 = vmul.f32 %v1911_v16, %v2578_v22  ;;  %v1233_v37 = vpop.xlane.xlu1 %1232 }
 0x32c   : > { %v1913_v48 = vpop.eup %1912  ;;  %v1253_v61 = vmul.f32 0.020408163, %v1233_v37 }
 0x32d   : > { %v1429_v15 = vmul.f32 %v2464_v51, %v1303_v47  ;;  %v1304_v50 = vmul.f32 %v1913_v48, %v2581_v62  ;;  %v1236_v3 = vpop.xlane.xlu0 %1235 }
 0x32e   : > { %v1271_v45 = vadd.f32 1e-05, %v1253_v61  ;;  %v1254_v52 = vmul.f32 0.020408163, %v1236_v3 }
 0x32f   : > { %v1555_v18 = vadd.f32 %v2501_v19, %v1429_v15  ;;  %v1430_v26 = vmul.f32 %v2466_v53, %v1304_v50  ;;  %v1541_v10 = vpop.permute.xlu1 %1540 }
 0x330   : > { %1918 = vrsqrt.f32 %v1271_v45  ;;  %v1272_v38 = vadd.f32 1e-05, %v1254_v52 }
 0x331   : > { %1573 = vst.msk [vmem:[%s2626_s27 + $0x60] sm:$0xff] %vm1074_vm1, %v1555_v18  ;;  %v1556_v22 = vadd.f32 %v2503_v20, %v1430_v26 }
 0x332   : > { %v1915_v58 = vpop.eup %1914  ;;  %1920 = vrsqrt.f32 %v1272_v38 }
 0x333   : > { %1574 = vst.msk [vmem:[%s2626_s27 + $0x68] sm:$0xff] %vm1074_vm1, %v1556_v22  ;;  %v1305_v51 = vmul.f32 %v1915_v58, %v2590_v9 }
 0x334   : > { %v1917_v62 = vpop.eup %1916 }
 0x335   : > { %v1431_v29 = vmul.f32 %v2469_v55, %v1305_v51  ;;  %v1306_v19 = vmul.f32 %v1917_v62, %v2593_v13  ;;  %v1536_v63 = vpop.permute.xlu0 %1535 }
 0x337   : > { %v1557_v53 = vadd.f32 %v2617_v11, %v1431_v29  ;;  %v1432_v4 = vmul.f32 %v2471_v57, %v1306_v19 }
 0x339   : > { %1575 = vst.msk [vmem:[%s2626_s27 + $0x70] sm:$0xff] %vm1074_vm1, %v1557_v53  ;;  %v1558_v20 = vadd.f32 %v2615_v59, %v1432_v4 }
 0x33a   : > { %v1919_v31 = vpop.eup %1918 }
 0x33b   : > { %1576 = vst.msk [vmem:[%s2626_s27 + $0x78] sm:$0xff] %vm1074_vm1, %v1558_v20  ;;  %v1307_v9 = vmul.f32 %v1919_v31, %v2728_v17 }
 0x33c   : > { %v1921_v27 = vpop.eup %1920 }
 0x33d   : > { %v1308_v55 = vmul.f32 %v1921_v27, %v2729_v41  ;;  %v1433_v13 = vmul.f32 %v2730_v5, %v1307_v9 }
 0x33f   : > { %v1434_v11 = vmul.f32 %v2731_v56, %v1308_v55  ;;  %v1559_v23 = vadd.f32 %v1536_v63, %v1433_v13 }
 0x341   : > { %v1560_v57 = vadd.f32 %v1541_v10, %v1434_v11  ;;  %1577 = vst.msk [vmem:[%s2626_s27 + $0x80] sm:$0xff] %vm1074_vm1, %v1559_v23 }
 0x343   : > { %1578 = vst.msk [vmem:[%s2626_s27 + $0x88] sm:$0xff] %vm1074_vm1, %v1560_v57 }
 0x344 PF: > { %s15_s18 = sadd.s32 1, %s1928_s18  }
 0x345   : > { %p12_p4 = scmp.ge.s32.totalorder %s15_s18, 4  }
 0x347   :  { %14 = sbr.rel (!%p12_p4) target bundleno = 1 (0x1), region = 76 }

</bundles_post_ra>
